<compile_context>
chip_gen: v5e
topology: v5e:2x2
jax: 0.10.0
libtpu: 0.0.40
codegen_flags: <defaults>
</compile_context>

<pallas_src>
import math
import numpy as np
import jax
import jax.numpy as jnp
from jax import lax
from jax.experimental import pallas as pl
from jax.experimental.pallas import tpu as pltpu

_VMEM_LIMIT = 32 * 1024 * 1024  # safe scoped-VMEM limit on v5e/v6e/v7x


# -----------------------------------------------------------------------------
# Model config (mirrors DarkNetTiny.__init__ / DarkNetBlock.__init__)
# -----------------------------------------------------------------------------
def _darknet_block_cfg(convs, ops, in_c, ch, n_layers, ksize=3, stride=1):
    ks = [ksize, 1] * (n_layers // 2) + [ksize]
    ss = [stride] + [1] * (n_layers - 1)
    for s, k in zip(ss, ks):
        c = ch if k == 3 else ch // 2
        convs.append(dict(k=k, s=s, cin=in_c, cout=c, bn=True))
        ops.append(("conv", len(convs) - 1))
        in_c = c
    return in_c


def darknet_tiny_config(channel, n_classes, n_blocks, muls, strides, in_channel):
    convs, ops = [], []
    for nb, mul, st in zip(n_blocks[:-1], muls[:-1], strides[:-1]):
        in_channel = _darknet_block_cfg(convs, ops, in_channel, channel * mul, nb,
                                        stride=st)
        ops.append(("maxpool",))
    in_channel = _darknet_block_cfg(convs, ops, in_channel, channel * muls[-1],
                                    n_blocks[-1], stride=strides[-1])
    # final Conv_Block(in_channel, n_classes, 1, 1, bn=False) + AvgPool + Flatten
    convs.append(dict(k=1, s=1, cin=in_channel, cout=n_classes, bn=False))
    ops.append(("head", len(convs) - 1))
    return convs, ops


def init_params(key, convs):
    params = []
    for i, cfg in enumerate(convs):
        k, cin, cout = cfg["k"], cfg["cin"], cfg["cout"]
        kw, ks, kb = jax.random.split(jax.random.fold_in(key, i), 3)
        w = jax.random.normal(kw, (k, k, cin, cout), jnp.float32) / math.sqrt(k * k * cin)
        if cfg["bn"]:
            scale = 1.0 + 0.1 * jax.random.normal(ks, (cout,), jnp.float32)
            bias = 0.1 * jax.random.normal(kb, (cout,), jnp.float32)
        else:
            scale = jnp.ones((cout,), jnp.float32)
            bias = 0.1 * jax.random.normal(kb, (cout,), jnp.float32)
        params.append((w, scale, bias))
    return params


# -----------------------------------------------------------------------------
# Static execution plan (shapes per layer) + one-time weight preprocessing
# -----------------------------------------------------------------------------
def make_plan(convs, ops, H, W, in_channel, activation):
    """Trace spatial dims through the net; emit static per-step descriptors."""
    plan, conv_ids = [], []
    h, w, cin = H, W, in_channel
    for op in ops:
        if op[0] in ("conv", "head"):
            cfg = convs[op[1]]
            # TODO(synk): stride > 1 not supported in the fused kernel.
            assert cfg["s"] == 1, "fused kernel only supports stride-1 convs"
            assert cfg["cin"] == cin
            act_fn = "relu" if op[0] == "head" else activation
            plan.append(dict(kind="conv", k=cfg["k"], p=cfg["k"] // 2, h=h, w=w,
                             cin=cin, cout=cfg["cout"], act=act_fn))
            conv_ids.append(op[1])
            cin = cfg["cout"]
            if op[0] == "head":
                plan.append(dict(kind="avgpool", h=h, w=w, c=cin))
        elif op[0] == "maxpool":
            assert h % 2 == 0 and w % 2 == 0
            plan.append(dict(kind="pool", h=h, w=w, c=cin))
            h, w = h // 2, w // 2
    return plan, conv_ids


def prepare_params(params, plan, conv_ids):
    """One-time preprocessing: BN fold, banded (block-Toeplitz) expansion,
    bias tiling, bf16 cast.  Runs in numpy -> zero per-forward HLOs."""
    prep, ci = [], 0
    for step in plan:
        if step["kind"] != "conv":
            continue
        wj, scale, bias = params[conv_ids[ci]]
        ci += 1
        k, p, w = step["k"], step["p"], step["w"]
        cin, cout = step["cin"], step["cout"]
        wf = np.asarray(wj, np.float32) * np.asarray(scale, np.float32).reshape(1, 1, 1, -1)
        # wb[dh, wi*Cin+ci, wo*Cout+co] = wf[dh, dw, ci, co] where wi = wo+dw-p
        wb = np.zeros((k, w * cin, w * cout), np.float32)
        for dh in range(k):
            for dw in range(k):
                for wo in range(w):
                    wi = wo + dw - p
                    if 0 <= wi < w:
                        wb[dh, wi * cin:(wi + 1) * cin,
                           wo * cout:(wo + 1) * cout] = wf[dh, dw]
        bt = np.tile(np.asarray(bias, np.float32), w).reshape(1, w * cout)
        prep.append((jnp.asarray(wb, jnp.bfloat16), jnp.asarray(bt, jnp.float32)))
    return prep


# -----------------------------------------------------------------------------
# The fused Pallas kernel
# -----------------------------------------------------------------------------
def darknet_tiny_fused_forward(x_nchw, plan, prep, n_classes):
    """Whole DarkNetTiny forward in one pallas_call, one image per grid step."""
    N, C0, H, W = x_nchw.shape
    # single boundary transpose (NCHW -> NHWC) + free HBM reshape to (H, W*C)
    x = jnp.transpose(x_nchw, (0, 2, 3, 1)).reshape(N, H, W * C0).astype(jnp.float32)

    def kernel(x_ref, *args):
        o_ref = args[-1]
        wrefs = args[:-1]
        act = x_ref[0]                                   # (H, W*Cin) f32, resident
        wi = 0
        for step in plan:
            if step["kind"] == "conv":
                k, p = step["k"], step["p"]
                h, w = step["h"], step["w"]
                cin = step["cin"]
                w_ref, b_ref = wrefs[wi], wrefs[wi + 1]
                wi += 2
                if p > 0:                                # zero-pad rows only (W handled by band)
                    zr = jnp.zeros((p, w * cin), act.dtype)
                    act = jnp.concatenate([zr, act, zr], axis=0)
                act_b = act.astype(jnp.bfloat16)
                # k accumulated MXU dots; LHS = pure sublane slice, f32 accum.
                acc = jnp.dot(act_b[0:h, :], w_ref[0],
                              preferred_element_type=jnp.float32)
                for dh in range(1, k):
                    acc = acc + jnp.dot(act_b[dh:dh + h, :], w_ref[dh],
                                        preferred_element_type=jnp.float32)
                y = acc + b_ref[...]                     # (h, w*cout) f32 epilogue
                if step["act"] == "relu":
                    act = jnp.maximum(y, 0.0)
                else:                                    # leaky relu
                    act = jnp.where(y > 0, y, 0.1 * y)
            elif step["kind"] == "pool":                 # fused 2x2/2 maxpool
                h, w, c = step["h"], step["w"], step["c"]
                a = act.reshape(h // 2, 2, w * c)
                a = jnp.maximum(a[:, 0, :], a[:, 1, :])          # vertical max
                a = a.reshape(h // 2, w // 2, 2 * c)
                a = jnp.maximum(a[:, :, :c], a[:, :, c:])        # horizontal max
                act = a.reshape(h // 2, (w // 2) * c)
            else:                                        # global average pool + flatten
                h, w, c = step["h"], step["w"], step["c"]
                s = jnp.sum(act, axis=0, keepdims=True)          # (1, w*c)
                tot = s[:, 0:c]
                for j in range(1, w):
                    tot = tot + s[:, j * c:(j + 1) * c]
                o_ref[0] = tot * (1.0 / float(h * w))            # (1, n_classes)

    in_specs = [pl.BlockSpec((1, H, W * C0), lambda n: (n, 0, 0))]
    inputs = [x]
    for wb, bt in prep:
        in_specs.append(pl.BlockSpec(wb.shape, lambda n: (0, 0, 0)))
        in_specs.append(pl.BlockSpec(bt.shape, lambda n: (0, 0)))
        inputs.extend([wb, bt])

    out = pl.pallas_call(
        kernel,
        out_shape=jax.ShapeDtypeStruct((N, 1, n_classes), jnp.float32),
        grid_spec=pltpu.PrefetchScalarGridSpec(
            num_scalar_prefetch=0,
            grid=(N,),
            in_specs=in_specs,
            out_specs=pl.BlockSpec((1, 1, n_classes), lambda n: (n, 0, 0)),
        ),
        compiler_params=pltpu.CompilerParams(
            dimension_semantics=("parallel",),      # v7x: one image per TensorCore
            vmem_limit_bytes=_VMEM_LIMIT),
    )(*inputs)
    return out.reshape(N, n_classes)                 # free HBM reshape


# -----------------------------------------------------------------------------
# Pure-JAX reference (same bf16-operand / f32-accumulation numerics)
# -----------------------------------------------------------------------------
def ref_forward(x_nchw, convs, ops, params, activation="relu"):
    x = jnp.transpose(x_nchw, (0, 2, 3, 1)).astype(jnp.float32)
    for op in ops:
        if op[0] == "conv":
            cfg = convs[op[1]]
            w, sc, b = params[op[1]]
            k, s = cfg["k"], cfg["s"]
            p = k // 2
            wf = (w * sc.reshape(1, 1, 1, -1)).astype(jnp.bfloat16)
            y = lax.conv_general_dilated(
                x.astype(jnp.bfloat16), wf, window_strides=(s, s),
                padding=[(p, p), (p, p)],
                dimension_numbers=("NHWC", "HWIO", "NHWC"),
                preferred_element_type=jnp.float32)
            y = y + b.reshape(1, 1, 1, -1)
            x = jnp.maximum(y, 0.0) if activation == "relu" else jnp.where(y > 0, y, 0.1 * y)
        elif op[0] == "maxpool":
            N, H, W, C = x.shape
            x = x.reshape(N, H // 2, 2, W // 2, 2, C).max(axis=(2, 4))
        else:  # head: 1x1 conv (bn=False) + ReLU + global avg pool + flatten
            cfg = convs[op[1]]
            w, _, b = params[op[1]]
            w2 = w.reshape(cfg["cin"], cfg["cout"]).astype(jnp.bfloat16)
            y = jnp.einsum("nhwc,co->nhwo", x.astype(jnp.bfloat16), w2,
                           preferred_element_type=jnp.float32)
            y = jnp.maximum(y + b.reshape(1, 1, 1, -1), 0.0)
            x = y.mean(axis=(1, 2))
    return x


# -----------------------------------------------------------------------------
if __name__ == "__main__":
    key = jax.random.PRNGKey(0)

    # Small DarkNetTiny hyper-parameters
    channel, n_classes = 8, 10
    n_blocks, muls, strides = [1, 3, 1], [1, 2, 4], [1, 1, 1]
    in_channel, activation = 4, "relu"

    convs, ops = darknet_tiny_config(channel, n_classes, n_blocks, muls, strides,
                                     in_channel)
    params = init_params(key, convs)

    # PyTorch-style NCHW input
    x = jax.random.normal(jax.random.fold_in(key, 123), (2, 4, 16, 16), jnp.float32)
    N, _, H, W = x.shape

    # one-time preprocessing (plan + banded bf16 weights + tiled biases)
    plan, conv_ids = make_plan(convs, ops, H, W, in_channel, activation)
    prep = prepare_params(params, plan, conv_ids)

    out = darknet_tiny_fused_forward(x, plan, prep, n_classes)
    out = jax.block_until_ready(out)
    assert out.shape == (N, n_classes), out.shape

    ref = jax.block_until_ready(ref_forward(x, convs, ops, params, activation))
    np.testing.assert_allclose(np.asarray(out), np.asarray(ref), rtol=2e-2, atol=2e-2)

    print("KERNEL_OK")
</pallas_src>

<mosaic_0001>
module attributes {stable_mosaic.version = 11 : i64} {
  func.func @kernel(%arg0: i32, %arg1: memref<1x16x64xf32, #tpu.memory_space<vmem>>, %arg2: memref<3x64x128xbf16, #tpu.memory_space<vmem>>, %arg3: memref<1x128xf32, #tpu.memory_space<vmem>>, %arg4: memref<3x64x128xbf16, #tpu.memory_space<vmem>>, %arg5: memref<1x128xf32, #tpu.memory_space<vmem>>, %arg6: memref<1x128x64xbf16, #tpu.memory_space<vmem>>, %arg7: memref<1x64xf32, #tpu.memory_space<vmem>>, %arg8: memref<3x64x128xbf16, #tpu.memory_space<vmem>>, %arg9: memref<1x128xf32, #tpu.memory_space<vmem>>, %arg10: memref<3x64x128xbf16, #tpu.memory_space<vmem>>, %arg11: memref<1x128xf32, #tpu.memory_space<vmem>>, %arg12: memref<1x128x40xbf16, #tpu.memory_space<vmem>>, %arg13: memref<1x40xf32, #tpu.memory_space<vmem>>, %arg14: memref<1x1x10xf32, #tpu.memory_space<vmem>>) attributes {dimension_semantics = [#tpu.dimension_semantics<parallel>], iteration_bounds = array<i64: 2>, scalar_prefetch = 0 : i64, scratch_operands = 0 : i64, tpu.core_type = #tpu.core_type<tc>, window_params = [{transform_indices = @transform_0, window_bounds = array<i64: 1, 16, 64>}, {pipeline_mode = #tpu.pipeline_mode<synchronous>, transform_indices = @transform_1, window_bounds = array<i64: 3, 64, 128>}, {pipeline_mode = #tpu.pipeline_mode<synchronous>, transform_indices = @transform_2, window_bounds = array<i64: 1, 128>}, {pipeline_mode = #tpu.pipeline_mode<synchronous>, transform_indices = @transform_3, window_bounds = array<i64: 3, 64, 128>}, {pipeline_mode = #tpu.pipeline_mode<synchronous>, transform_indices = @transform_4, window_bounds = array<i64: 1, 128>}, {pipeline_mode = #tpu.pipeline_mode<synchronous>, transform_indices = @transform_5, window_bounds = array<i64: 1, 128, 64>}, {pipeline_mode = #tpu.pipeline_mode<synchronous>, transform_indices = @transform_6, window_bounds = array<i64: 1, 64>}, {pipeline_mode = #tpu.pipeline_mode<synchronous>, transform_indices = @transform_7, window_bounds = array<i64: 3, 64, 128>}, {pipeline_mode = #tpu.pipeline_mode<synchronous>, transform_indices = @transform_8, window_bounds = array<i64: 1, 128>}, {pipeline_mode = #tpu.pipeline_mode<synchronous>, transform_indices = @transform_9, window_bounds = array<i64: 3, 64, 128>}, {pipeline_mode = #tpu.pipeline_mode<synchronous>, transform_indices = @transform_10, window_bounds = array<i64: 1, 128>}, {pipeline_mode = #tpu.pipeline_mode<synchronous>, transform_indices = @transform_11, window_bounds = array<i64: 1, 128, 40>}, {pipeline_mode = #tpu.pipeline_mode<synchronous>, transform_indices = @transform_12, window_bounds = array<i64: 1, 40>}, {transform_indices = @transform_13, window_bounds = array<i64: 1, 1, 10>}]} {
    %c0 = arith.constant 0 : index
    %c0_0 = arith.constant 0 : index
    %c0_1 = arith.constant 0 : index
    %0 = vector.load %arg1[%c0, %c0_0, %c0_1] : memref<1x16x64xf32, #tpu.memory_space<vmem>>, vector<1x16x64xf32>
    %1 = vector.shape_cast %0 : vector<1x16x64xf32> to vector<16x64xf32>
    %cst = arith.constant 0.000000e+00 : f32
    %2 = vector.broadcast %cst : f32 to vector<1x64xf32>
    %3 = tpu.concatenate %2, %1, %2 in 0 : vector<1x64xf32>, vector<16x64xf32>, vector<1x64xf32> -> vector<18x64xf32>
    %4 = arith.truncf %3 : vector<18x64xf32> to vector<18x64xbf16>
    %5 = vector.extract_strided_slice %4 {offsets = [0, 0], sizes = [16, 64], strides = [1, 1]} : vector<18x64xbf16> to vector<16x64xbf16>
    %c0_2 = arith.constant 0 : index
    %c0_3 = arith.constant 0 : index
    %c0_4 = arith.constant 0 : index
    %6 = vector.load %arg2[%c0_2, %c0_3, %c0_4] : memref<3x64x128xbf16, #tpu.memory_space<vmem>>, vector<1x64x128xbf16>
    %7 = vector.shape_cast %6 : vector<1x64x128xbf16> to vector<64x128xbf16>
    %cst_5 = arith.constant dense<0.000000e+00> : vector<16x128xf32>
    %8 = tpu.matmul %5, %7, %cst_5 {dimension_numbers = #tpu.dot_dimension_numbers<[1], [0], [0], [1], [0, 0, 1, 1], [], []>} : vector<16x64xbf16>, vector<64x128xbf16>, vector<16x128xf32> -> vector<16x128xf32>
    %9 = vector.extract_strided_slice %4 {offsets = [1, 0], sizes = [16, 64], strides = [1, 1]} : vector<18x64xbf16> to vector<16x64xbf16>
    %c1 = arith.constant 1 : index
    %c0_6 = arith.constant 0 : index
    %c0_7 = arith.constant 0 : index
    %10 = vector.load %arg2[%c1, %c0_6, %c0_7] : memref<3x64x128xbf16, #tpu.memory_space<vmem>>, vector<1x64x128xbf16>
    %11 = vector.shape_cast %10 : vector<1x64x128xbf16> to vector<64x128xbf16>
    %cst_8 = arith.constant dense<0.000000e+00> : vector<16x128xf32>
    %12 = tpu.matmul %9, %11, %cst_8 {dimension_numbers = #tpu.dot_dimension_numbers<[1], [0], [0], [1], [0, 0, 1, 1], [], []>} : vector<16x64xbf16>, vector<64x128xbf16>, vector<16x128xf32> -> vector<16x128xf32>
    %13 = arith.addf %8, %12 : vector<16x128xf32>
    %14 = vector.extract_strided_slice %4 {offsets = [2, 0], sizes = [16, 64], strides = [1, 1]} : vector<18x64xbf16> to vector<16x64xbf16>
    %c2 = arith.constant 2 : index
    %c0_9 = arith.constant 0 : index
    %c0_10 = arith.constant 0 : index
    %15 = vector.load %arg2[%c2, %c0_9, %c0_10] : memref<3x64x128xbf16, #tpu.memory_space<vmem>>, vector<1x64x128xbf16>
    %16 = vector.shape_cast %15 : vector<1x64x128xbf16> to vector<64x128xbf16>
    %cst_11 = arith.constant dense<0.000000e+00> : vector<16x128xf32>
    %17 = tpu.matmul %14, %16, %cst_11 {dimension_numbers = #tpu.dot_dimension_numbers<[1], [0], [0], [1], [0, 0, 1, 1], [], []>} : vector<16x64xbf16>, vector<64x128xbf16>, vector<16x128xf32> -> vector<16x128xf32>
    %18 = arith.addf %13, %17 : vector<16x128xf32>
    %c0_12 = arith.constant 0 : index
    %c0_13 = arith.constant 0 : index
    %19 = vector.load %arg3[%c0_12, %c0_13] : memref<1x128xf32, #tpu.memory_space<vmem>>, vector<1x128xf32>
    %20 = vector.broadcast %19 : vector<1x128xf32> to vector<16x128xf32>
    %21 = arith.addf %18, %20 : vector<16x128xf32>
    %cst_14 = arith.constant 0.000000e+00 : f32
    %22 = vector.broadcast %cst_14 : f32 to vector<16x128xf32>
    %23 = arith.maximumf %21, %22 : vector<16x128xf32>
    %24 = vector.shape_cast %23 : vector<16x128xf32> to vector<8x2x128xf32>
    %25 = vector.extract_strided_slice %24 {offsets = [0, 0, 0], sizes = [8, 1, 128], strides = [1, 1, 1]} : vector<8x2x128xf32> to vector<8x1x128xf32>
    %26 = vector.shape_cast %25 : vector<8x1x128xf32> to vector<8x128xf32>
    %27 = vector.extract_strided_slice %24 {offsets = [0, 1, 0], sizes = [8, 1, 128], strides = [1, 1, 1]} : vector<8x2x128xf32> to vector<8x1x128xf32>
    %28 = vector.shape_cast %27 : vector<8x1x128xf32> to vector<8x128xf32>
    %29 = arith.maximumf %26, %28 : vector<8x128xf32>
    %30 = vector.shape_cast %29 : vector<8x128xf32> to vector<8x8x16xf32>
    %31 = vector.extract_strided_slice %30 {offsets = [0, 0, 0], sizes = [8, 8, 8], strides = [1, 1, 1]} : vector<8x8x16xf32> to vector<8x8x8xf32>
    %32 = vector.extract_strided_slice %30 {offsets = [0, 0, 8], sizes = [8, 8, 8], strides = [1, 1, 1]} : vector<8x8x16xf32> to vector<8x8x8xf32>
    %33 = arith.maximumf %31, %32 : vector<8x8x8xf32>
    %34 = vector.shape_cast %33 : vector<8x8x8xf32> to vector<8x64xf32>
    %cst_15 = arith.constant 0.000000e+00 : f32
    %35 = vector.broadcast %cst_15 : f32 to vector<1x64xf32>
    %36 = tpu.concatenate %35, %34, %35 in 0 : vector<1x64xf32>, vector<8x64xf32>, vector<1x64xf32> -> vector<10x64xf32>
    %37 = arith.truncf %36 : vector<10x64xf32> to vector<10x64xbf16>
    %38 = vector.extract_strided_slice %37 {offsets = [0, 0], sizes = [8, 64], strides = [1, 1]} : vector<10x64xbf16> to vector<8x64xbf16>
    %c0_16 = arith.constant 0 : index
    %c0_17 = arith.constant 0 : index
    %c0_18 = arith.constant 0 : index
    %39 = vector.load %arg4[%c0_16, %c0_17, %c0_18] : memref<3x64x128xbf16, #tpu.memory_space<vmem>>, vector<1x64x128xbf16>
    %40 = vector.shape_cast %39 : vector<1x64x128xbf16> to vector<64x128xbf16>
    %cst_19 = arith.constant dense<0.000000e+00> : vector<8x128xf32>
    %41 = tpu.matmul %38, %40, %cst_19 {dimension_numbers = #tpu.dot_dimension_numbers<[1], [0], [0], [1], [0, 0, 1, 1], [], []>} : vector<8x64xbf16>, vector<64x128xbf16>, vector<8x128xf32> -> vector<8x128xf32>
    %42 = vector.extract_strided_slice %37 {offsets = [1, 0], sizes = [8, 64], strides = [1, 1]} : vector<10x64xbf16> to vector<8x64xbf16>
    %c1_20 = arith.constant 1 : index
    %c0_21 = arith.constant 0 : index
    %c0_22 = arith.constant 0 : index
    %43 = vector.load %arg4[%c1_20, %c0_21, %c0_22] : memref<3x64x128xbf16, #tpu.memory_space<vmem>>, vector<1x64x128xbf16>
    %44 = vector.shape_cast %43 : vector<1x64x128xbf16> to vector<64x128xbf16>
    %cst_23 = arith.constant dense<0.000000e+00> : vector<8x128xf32>
    %45 = tpu.matmul %42, %44, %cst_23 {dimension_numbers = #tpu.dot_dimension_numbers<[1], [0], [0], [1], [0, 0, 1, 1], [], []>} : vector<8x64xbf16>, vector<64x128xbf16>, vector<8x128xf32> -> vector<8x128xf32>
    %46 = arith.addf %41, %45 : vector<8x128xf32>
    %47 = vector.extract_strided_slice %37 {offsets = [2, 0], sizes = [8, 64], strides = [1, 1]} : vector<10x64xbf16> to vector<8x64xbf16>
    %c2_24 = arith.constant 2 : index
    %c0_25 = arith.constant 0 : index
    %c0_26 = arith.constant 0 : index
    %48 = vector.load %arg4[%c2_24, %c0_25, %c0_26] : memref<3x64x128xbf16, #tpu.memory_space<vmem>>, vector<1x64x128xbf16>
    %49 = vector.shape_cast %48 : vector<1x64x128xbf16> to vector<64x128xbf16>
    %cst_27 = arith.constant dense<0.000000e+00> : vector<8x128xf32>
    %50 = tpu.matmul %47, %49, %cst_27 {dimension_numbers = #tpu.dot_dimension_numbers<[1], [0], [0], [1], [0, 0, 1, 1], [], []>} : vector<8x64xbf16>, vector<64x128xbf16>, vector<8x128xf32> -> vector<8x128xf32>
    %51 = arith.addf %46, %50 : vector<8x128xf32>
    %c0_28 = arith.constant 0 : index
    %c0_29 = arith.constant 0 : index
    %52 = vector.load %arg5[%c0_28, %c0_29] : memref<1x128xf32, #tpu.memory_space<vmem>>, vector<1x128xf32>
    %53 = vector.broadcast %52 : vector<1x128xf32> to vector<8x128xf32>
    %54 = arith.addf %51, %53 : vector<8x128xf32>
    %cst_30 = arith.constant 0.000000e+00 : f32
    %55 = vector.broadcast %cst_30 : f32 to vector<8x128xf32>
    %56 = arith.maximumf %54, %55 : vector<8x128xf32>
    %57 = arith.truncf %56 : vector<8x128xf32> to vector<8x128xbf16>
    %c0_31 = arith.constant 0 : index
    %c0_32 = arith.constant 0 : index
    %c0_33 = arith.constant 0 : index
    %58 = vector.load %arg6[%c0_31, %c0_32, %c0_33] : memref<1x128x64xbf16, #tpu.memory_space<vmem>>, vector<1x128x64xbf16>
    %59 = vector.shape_cast %58 : vector<1x128x64xbf16> to vector<128x64xbf16>
    %cst_34 = arith.constant dense<0.000000e+00> : vector<8x64xf32>
    %60 = tpu.matmul %57, %59, %cst_34 {dimension_numbers = #tpu.dot_dimension_numbers<[1], [0], [0], [1], [0, 0, 1, 1], [], []>} : vector<8x128xbf16>, vector<128x64xbf16>, vector<8x64xf32> -> vector<8x64xf32>
    %c0_35 = arith.constant 0 : index
    %c0_36 = arith.constant 0 : index
    %61 = vector.load %arg7[%c0_35, %c0_36] : memref<1x64xf32, #tpu.memory_space<vmem>>, vector<1x64xf32>
    %62 = vector.broadcast %61 : vector<1x64xf32> to vector<8x64xf32>
    %63 = arith.addf %60, %62 : vector<8x64xf32>
    %cst_37 = arith.constant 0.000000e+00 : f32
    %64 = vector.broadcast %cst_37 : f32 to vector<8x64xf32>
    %65 = arith.maximumf %63, %64 : vector<8x64xf32>
    %cst_38 = arith.constant 0.000000e+00 : f32
    %66 = vector.broadcast %cst_38 : f32 to vector<1x64xf32>
    %67 = tpu.concatenate %66, %65, %66 in 0 : vector<1x64xf32>, vector<8x64xf32>, vector<1x64xf32> -> vector<10x64xf32>
    %68 = arith.truncf %67 : vector<10x64xf32> to vector<10x64xbf16>
    %69 = vector.extract_strided_slice %68 {offsets = [0, 0], sizes = [8, 64], strides = [1, 1]} : vector<10x64xbf16> to vector<8x64xbf16>
    %c0_39 = arith.constant 0 : index
    %c0_40 = arith.constant 0 : index
    %c0_41 = arith.constant 0 : index
    %70 = vector.load %arg8[%c0_39, %c0_40, %c0_41] : memref<3x64x128xbf16, #tpu.memory_space<vmem>>, vector<1x64x128xbf16>
    %71 = vector.shape_cast %70 : vector<1x64x128xbf16> to vector<64x128xbf16>
    %cst_42 = arith.constant dense<0.000000e+00> : vector<8x128xf32>
    %72 = tpu.matmul %69, %71, %cst_42 {dimension_numbers = #tpu.dot_dimension_numbers<[1], [0], [0], [1], [0, 0, 1, 1], [], []>} : vector<8x64xbf16>, vector<64x128xbf16>, vector<8x128xf32> -> vector<8x128xf32>
    %73 = vector.extract_strided_slice %68 {offsets = [1, 0], sizes = [8, 64], strides = [1, 1]} : vector<10x64xbf16> to vector<8x64xbf16>
    %c1_43 = arith.constant 1 : index
    %c0_44 = arith.constant 0 : index
    %c0_45 = arith.constant 0 : index
    %74 = vector.load %arg8[%c1_43, %c0_44, %c0_45] : memref<3x64x128xbf16, #tpu.memory_space<vmem>>, vector<1x64x128xbf16>
    %75 = vector.shape_cast %74 : vector<1x64x128xbf16> to vector<64x128xbf16>
    %cst_46 = arith.constant dense<0.000000e+00> : vector<8x128xf32>
    %76 = tpu.matmul %73, %75, %cst_46 {dimension_numbers = #tpu.dot_dimension_numbers<[1], [0], [0], [1], [0, 0, 1, 1], [], []>} : vector<8x64xbf16>, vector<64x128xbf16>, vector<8x128xf32> -> vector<8x128xf32>
    %77 = arith.addf %72, %76 : vector<8x128xf32>
    %78 = vector.extract_strided_slice %68 {offsets = [2, 0], sizes = [8, 64], strides = [1, 1]} : vector<10x64xbf16> to vector<8x64xbf16>
    %c2_47 = arith.constant 2 : index
    %c0_48 = arith.constant 0 : index
    %c0_49 = arith.constant 0 : index
    %79 = vector.load %arg8[%c2_47, %c0_48, %c0_49] : memref<3x64x128xbf16, #tpu.memory_space<vmem>>, vector<1x64x128xbf16>
    %80 = vector.shape_cast %79 : vector<1x64x128xbf16> to vector<64x128xbf16>
    %cst_50 = arith.constant dense<0.000000e+00> : vector<8x128xf32>
    %81 = tpu.matmul %78, %80, %cst_50 {dimension_numbers = #tpu.dot_dimension_numbers<[1], [0], [0], [1], [0, 0, 1, 1], [], []>} : vector<8x64xbf16>, vector<64x128xbf16>, vector<8x128xf32> -> vector<8x128xf32>
    %82 = arith.addf %77, %81 : vector<8x128xf32>
    %c0_51 = arith.constant 0 : index
    %c0_52 = arith.constant 0 : index
    %83 = vector.load %arg9[%c0_51, %c0_52] : memref<1x128xf32, #tpu.memory_space<vmem>>, vector<1x128xf32>
    %84 = vector.broadcast %83 : vector<1x128xf32> to vector<8x128xf32>
    %85 = arith.addf %82, %84 : vector<8x128xf32>
    %cst_53 = arith.constant 0.000000e+00 : f32
    %86 = vector.broadcast %cst_53 : f32 to vector<8x128xf32>
    %87 = arith.maximumf %85, %86 : vector<8x128xf32>
    %88 = vector.shape_cast %87 : vector<8x128xf32> to vector<4x2x128xf32>
    %89 = vector.extract_strided_slice %88 {offsets = [0, 0, 0], sizes = [4, 1, 128], strides = [1, 1, 1]} : vector<4x2x128xf32> to vector<4x1x128xf32>
    %90 = vector.shape_cast %89 : vector<4x1x128xf32> to vector<4x128xf32>
    %91 = vector.extract_strided_slice %88 {offsets = [0, 1, 0], sizes = [4, 1, 128], strides = [1, 1, 1]} : vector<4x2x128xf32> to vector<4x1x128xf32>
    %92 = vector.shape_cast %91 : vector<4x1x128xf32> to vector<4x128xf32>
    %93 = arith.maximumf %90, %92 : vector<4x128xf32>
    %94 = vector.shape_cast %93 : vector<4x128xf32> to vector<4x4x32xf32>
    %95 = vector.extract_strided_slice %94 {offsets = [0, 0, 0], sizes = [4, 4, 16], strides = [1, 1, 1]} : vector<4x4x32xf32> to vector<4x4x16xf32>
    %96 = vector.extract_strided_slice %94 {offsets = [0, 0, 16], sizes = [4, 4, 16], strides = [1, 1, 1]} : vector<4x4x32xf32> to vector<4x4x16xf32>
    %97 = arith.maximumf %95, %96 : vector<4x4x16xf32>
    %98 = vector.shape_cast %97 : vector<4x4x16xf32> to vector<4x64xf32>
    %cst_54 = arith.constant 0.000000e+00 : f32
    %99 = vector.broadcast %cst_54 : f32 to vector<1x64xf32>
    %100 = tpu.concatenate %99, %98, %99 in 0 : vector<1x64xf32>, vector<4x64xf32>, vector<1x64xf32> -> vector<6x64xf32>
    %101 = arith.truncf %100 : vector<6x64xf32> to vector<6x64xbf16>
    %102 = vector.extract_strided_slice %101 {offsets = [0, 0], sizes = [4, 64], strides = [1, 1]} : vector<6x64xbf16> to vector<4x64xbf16>
    %c0_55 = arith.constant 0 : index
    %c0_56 = arith.constant 0 : index
    %c0_57 = arith.constant 0 : index
    %103 = vector.load %arg10[%c0_55, %c0_56, %c0_57] : memref<3x64x128xbf16, #tpu.memory_space<vmem>>, vector<1x64x128xbf16>
    %104 = vector.shape_cast %103 : vector<1x64x128xbf16> to vector<64x128xbf16>
    %cst_58 = arith.constant dense<0.000000e+00> : vector<4x128xf32>
    %105 = tpu.matmul %102, %104, %cst_58 {dimension_numbers = #tpu.dot_dimension_numbers<[1], [0], [0], [1], [0, 0, 1, 1], [], []>} : vector<4x64xbf16>, vector<64x128xbf16>, vector<4x128xf32> -> vector<4x128xf32>
    %106 = vector.extract_strided_slice %101 {offsets = [1, 0], sizes = [4, 64], strides = [1, 1]} : vector<6x64xbf16> to vector<4x64xbf16>
    %c1_59 = arith.constant 1 : index
    %c0_60 = arith.constant 0 : index
    %c0_61 = arith.constant 0 : index
    %107 = vector.load %arg10[%c1_59, %c0_60, %c0_61] : memref<3x64x128xbf16, #tpu.memory_space<vmem>>, vector<1x64x128xbf16>
    %108 = vector.shape_cast %107 : vector<1x64x128xbf16> to vector<64x128xbf16>
    %cst_62 = arith.constant dense<0.000000e+00> : vector<4x128xf32>
    %109 = tpu.matmul %106, %108, %cst_62 {dimension_numbers = #tpu.dot_dimension_numbers<[1], [0], [0], [1], [0, 0, 1, 1], [], []>} : vector<4x64xbf16>, vector<64x128xbf16>, vector<4x128xf32> -> vector<4x128xf32>
    %110 = arith.addf %105, %109 : vector<4x128xf32>
    %111 = vector.extract_strided_slice %101 {offsets = [2, 0], sizes = [4, 64], strides = [1, 1]} : vector<6x64xbf16> to vector<4x64xbf16>
    %c2_63 = arith.constant 2 : index
    %c0_64 = arith.constant 0 : index
    %c0_65 = arith.constant 0 : index
    %112 = vector.load %arg10[%c2_63, %c0_64, %c0_65] : memref<3x64x128xbf16, #tpu.memory_space<vmem>>, vector<1x64x128xbf16>
    %113 = vector.shape_cast %112 : vector<1x64x128xbf16> to vector<64x128xbf16>
    %cst_66 = arith.constant dense<0.000000e+00> : vector<4x128xf32>
    %114 = tpu.matmul %111, %113, %cst_66 {dimension_numbers = #tpu.dot_dimension_numbers<[1], [0], [0], [1], [0, 0, 1, 1], [], []>} : vector<4x64xbf16>, vector<64x128xbf16>, vector<4x128xf32> -> vector<4x128xf32>
    %115 = arith.addf %110, %114 : vector<4x128xf32>
    %c0_67 = arith.constant 0 : index
    %c0_68 = arith.constant 0 : index
    %116 = vector.load %arg11[%c0_67, %c0_68] : memref<1x128xf32, #tpu.memory_space<vmem>>, vector<1x128xf32>
    %117 = vector.broadcast %116 : vector<1x128xf32> to vector<4x128xf32>
    %118 = arith.addf %115, %117 : vector<4x128xf32>
    %cst_69 = arith.constant 0.000000e+00 : f32
    %119 = vector.broadcast %cst_69 : f32 to vector<4x128xf32>
    %120 = arith.maximumf %118, %119 : vector<4x128xf32>
    %121 = arith.truncf %120 : vector<4x128xf32> to vector<4x128xbf16>
    %c0_70 = arith.constant 0 : index
    %c0_71 = arith.constant 0 : index
    %c0_72 = arith.constant 0 : index
    %122 = vector.load %arg12[%c0_70, %c0_71, %c0_72] : memref<1x128x40xbf16, #tpu.memory_space<vmem>>, vector<1x128x40xbf16>
    %123 = vector.shape_cast %122 : vector<1x128x40xbf16> to vector<128x40xbf16>
    %cst_73 = arith.constant dense<0.000000e+00> : vector<4x40xf32>
    %124 = tpu.matmul %121, %123, %cst_73 {dimension_numbers = #tpu.dot_dimension_numbers<[1], [0], [0], [1], [0, 0, 1, 1], [], []>} : vector<4x128xbf16>, vector<128x40xbf16>, vector<4x40xf32> -> vector<4x40xf32>
    %c0_74 = arith.constant 0 : index
    %c0_75 = arith.constant 0 : index
    %125 = vector.load %arg13[%c0_74, %c0_75] : memref<1x40xf32, #tpu.memory_space<vmem>>, vector<1x40xf32>
    %126 = vector.broadcast %125 : vector<1x40xf32> to vector<4x40xf32>
    %127 = arith.addf %124, %126 : vector<4x40xf32>
    %cst_76 = arith.constant 0.000000e+00 : f32
    %128 = vector.broadcast %cst_76 : f32 to vector<4x40xf32>
    %129 = arith.maximumf %127, %128 : vector<4x40xf32>
    %cst_77 = arith.constant dense<0.000000e+00> : vector<40xf32>
    %130 = vector.multi_reduction <add>, %129, %cst_77 [0] : vector<4x40xf32> to vector<40xf32>
    %131 = vector.shape_cast %130 : vector<40xf32> to vector<1x40xf32>
    %132 = vector.extract_strided_slice %131 {offsets = [0, 0], sizes = [1, 10], strides = [1, 1]} : vector<1x40xf32> to vector<1x10xf32>
    %133 = vector.extract_strided_slice %131 {offsets = [0, 10], sizes = [1, 10], strides = [1, 1]} : vector<1x40xf32> to vector<1x10xf32>
    %134 = arith.addf %132, %133 : vector<1x10xf32>
    %135 = vector.extract_strided_slice %131 {offsets = [0, 20], sizes = [1, 10], strides = [1, 1]} : vector<1x40xf32> to vector<1x10xf32>
    %136 = arith.addf %134, %135 : vector<1x10xf32>
    %137 = vector.extract_strided_slice %131 {offsets = [0, 30], sizes = [1, 10], strides = [1, 1]} : vector<1x40xf32> to vector<1x10xf32>
    %138 = arith.addf %136, %137 : vector<1x10xf32>
    %cst_78 = arith.constant 6.250000e-02 : f32
    %139 = vector.broadcast %cst_78 : f32 to vector<1x10xf32>
    %140 = arith.mulf %138, %139 : vector<1x10xf32>
    %c0_79 = arith.constant 0 : index
    %c0_80 = arith.constant 0 : index
    %c0_81 = arith.constant 0 : index
    %141 = vector.load %arg14[%c0_79, %c0_80, %c0_81] : memref<1x1x10xf32, #tpu.memory_space<vmem>>, vector<1x1x10xf32>
    %142 = vector.shape_cast %141 : vector<1x1x10xf32> to vector<1x10xf32>
    %143 = vector.shape_cast %140 : vector<1x10xf32> to vector<1x1x10xf32>
    tpu.vector_store %arg14[%c0_79, %c0_80, %c0_81], %143 {strides = array<i32>} : memref<1x1x10xf32, #tpu.memory_space<vmem>>, vector<1x1x10xf32>,
    return
  }
  func.func @transform_0(%arg0: i32) -> (i32, i32, i32) {
    %c0_i32 = arith.constant 0 : i32
    %c0_i32_0 = arith.constant 0 : i32
    %c0_i32_1 = arith.constant 0 : i32
    return %arg0, %c0_i32, %c0_i32_0 : i32, i32, i32
  }
  func.func @transform_1(%arg0: i32) -> (i32, i32, i32) {
    %c0_i32 = arith.constant 0 : i32
    %c0_i32_0 = arith.constant 0 : i32
    %c0_i32_1 = arith.constant 0 : i32
    %c0_i32_2 = arith.constant 0 : i32
    return %c0_i32, %c0_i32_0, %c0_i32_1 : i32, i32, i32
  }
  func.func @transform_2(%arg0: i32) -> (i32, i32) {
    %c0_i32 = arith.constant 0 : i32
    %c0_i32_0 = arith.constant 0 : i32
    %c0_i32_1 = arith.constant 0 : i32
    return %c0_i32, %c0_i32_0 : i32, i32
  }
  func.func @transform_3(%arg0: i32) -> (i32, i32, i32) {
    %c0_i32 = arith.constant 0 : i32
    %c0_i32_0 = arith.constant 0 : i32
    %c0_i32_1 = arith.constant 0 : i32
    %c0_i32_2 = arith.constant 0 : i32
    return %c0_i32, %c0_i32_0, %c0_i32_1 : i32, i32, i32
  }
  func.func @transform_4(%arg0: i32) -> (i32, i32) {
    %c0_i32 = arith.constant 0 : i32
    %c0_i32_0 = arith.constant 0 : i32
    %c0_i32_1 = arith.constant 0 : i32
    return %c0_i32, %c0_i32_0 : i32, i32
  }
  func.func @transform_5(%arg0: i32) -> (i32, i32, i32) {
    %c0_i32 = arith.constant 0 : i32
    %c0_i32_0 = arith.constant 0 : i32
    %c0_i32_1 = arith.constant 0 : i32
    %c0_i32_2 = arith.constant 0 : i32
    return %c0_i32, %c0_i32_0, %c0_i32_1 : i32, i32, i32
  }
  func.func @transform_6(%arg0: i32) -> (i32, i32) {
    %c0_i32 = arith.constant 0 : i32
    %c0_i32_0 = arith.constant 0 : i32
    %c0_i32_1 = arith.constant 0 : i32
    return %c0_i32, %c0_i32_0 : i32, i32
  }
  func.func @transform_7(%arg0: i32) -> (i32, i32, i32) {
    %c0_i32 = arith.constant 0 : i32
    %c0_i32_0 = arith.constant 0 : i32
    %c0_i32_1 = arith.constant 0 : i32
    %c0_i32_2 = arith.constant 0 : i32
    return %c0_i32, %c0_i32_0, %c0_i32_1 : i32, i32, i32
  }
  func.func @transform_8(%arg0: i32) -> (i32, i32) {
    %c0_i32 = arith.constant 0 : i32
    %c0_i32_0 = arith.constant 0 : i32
    %c0_i32_1 = arith.constant 0 : i32
    return %c0_i32, %c0_i32_0 : i32, i32
  }
  func.func @transform_9(%arg0: i32) -> (i32, i32, i32) {
    %c0_i32 = arith.constant 0 : i32
    %c0_i32_0 = arith.constant 0 : i32
    %c0_i32_1 = arith.constant 0 : i32
    %c0_i32_2 = arith.constant 0 : i32
    return %c0_i32, %c0_i32_0, %c0_i32_1 : i32, i32, i32
  }
  func.func @transform_10(%arg0: i32) -> (i32, i32) {
    %c0_i32 = arith.constant 0 : i32
    %c0_i32_0 = arith.constant 0 : i32
    %c0_i32_1 = arith.constant 0 : i32
    return %c0_i32, %c0_i32_0 : i32, i32
  }
  func.func @transform_11(%arg0: i32) -> (i32, i32, i32) {
    %c0_i32 = arith.constant 0 : i32
    %c0_i32_0 = arith.constant 0 : i32
    %c0_i32_1 = arith.constant 0 : i32
    %c0_i32_2 = arith.constant 0 : i32
    return %c0_i32, %c0_i32_0, %c0_i32_1 : i32, i32, i32
  }
  func.func @transform_12(%arg0: i32) -> (i32, i32) {
    %c0_i32 = arith.constant 0 : i32
    %c0_i32_0 = arith.constant 0 : i32
    %c0_i32_1 = arith.constant 0 : i32
    return %c0_i32, %c0_i32_0 : i32, i32
  }
  func.func @transform_13(%arg0: i32) -> (i32, i32, i32) {
    %c0_i32 = arith.constant 0 : i32
    %c0_i32_0 = arith.constant 0 : i32
    %c0_i32_1 = arith.constant 0 : i32
    return %arg0, %c0_i32, %c0_i32_0 : i32, i32, i32
  }
}

</mosaic_0001>

<bundles_post_ra>
// kernel: tpu_custom_call.1
= control target key start
LH: loop header
LB: loop body
LE: loop exit
PB: predicated region body
PF: predicated region fallthrough
CT: control target
= control target key end

     0   :  { %s4352_s0 = inlined_call_operand.vmem [shape: f32[2,16,64], index: 0, kind: input, shape index: {}]   ;;  %s4353_s1 = inlined_call_operand.vmem [shape: bf16[3,64,128], index: 1, kind: input, shape index: {}]   ;;  %s4354_s2 = inlined_call_operand.vmem [shape: f32[1,128], index: 2, kind: input, shape index: {}]   ;;  %s4355_s3 = inlined_call_operand.hbm [shape: bf16[3,64,128], index: 3, kind: input, shape index: {}]   ;;  %s4356_s4 = inlined_call_operand.vmem [shape: f32[1,128], index: 4, kind: input, shape index: {}]   ;;  %s4357_s5 = inlined_call_operand.vmem [shape: bf16[1,128,64], index: 5, kind: input, shape index: {}]   ;;  %s4358_s6 = inlined_call_operand.vmem [shape: f32[1,64], index: 6, kind: input, shape index: {}]   ;;  %s4359_s7 = inlined_call_operand.hbm [shape: bf16[3,64,128], index: 7, kind: input, shape index: {}]   ;;  %s4360_s8 = inlined_call_operand.vmem [shape: f32[1,128], index: 8, kind: input, shape index: {}]   ;;  %s4361_s9 = inlined_call_operand.hbm [shape: bf16[3,64,128], index: 9, kind: input, shape index: {}]   ;;  %s4362_s10 = inlined_call_operand.vmem [shape: f32[1,128], index: 10, kind: input, shape index: {}]   ;;  %s4363_s11 = inlined_call_operand.vmem [shape: bf16[1,128,40], index: 11, kind: input, shape index: {}]   ;;  %s4364_s12 = inlined_call_operand.vmem [shape: f32[1,40], index: 12, kind: input, shape index: {}]   ;;  %s4365_s13 = inlined_call_operand.hbm [shape: f32[2,1,10], index: 13, kind: output, shape index: {}]  }
   0x1   :  { %4372 = sst [smem:[#allocation17_spill]] %s4355_s3 }
   0x2   :  { %4373 = sst [smem:[#allocation18_spill]] %s4359_s7 }
   0x3   :  { %18 = vsyncpa [#allocation3], 0 }
   0x4   :  { %19 = vsyncpa [#allocation6], 0 }
   0x5   :  { %20 = vsyncpa [#allocation4], 0 }
   0x6   :  { %22 = vsyncpa [#allocation4 + $0x1], 0  ;;  %s3450_s25 = smov 0   ;;  %s3452_s26 = smov 0  }
   0x7   :  { %s3454_s27 = smov 0   ;;  %s3456_s28 = smov 0  }
   0x8 LB: > { %4374 = sst [smem:[#allocation12_spill]] %s3345_s25  ;;  %s3471_s29 = sadd.s32 4294967295, %s3357_s28   ;;  %s3357_s28 = sphi %s3456_s28, %s4388_s28   ;;  %s3353_s27 = sphi %s3454_s27, %s4390_s27   ;;  %s3349_s26 = sphi %s3452_s26, %s4392_s26   ;;  %s3345_s25 = sphi %s3450_s25, %s4391_s25  }
   0x9   : > { %4375 = sst [smem:[#allocation13_spill]] %s3353_s27  ;;  %s2728_s30 = sadd.s32 4294967294, %s3357_s28  }
   0xa   : > { %s3475_s14 = sadd.s32 1, %s3357_s28   ;;  %s313_s15 = sadd.s32 1, %s3353_s27 }
   0xb   : > { %4376 = sst [smem:[#allocation14_spill]] %s3475_s14  ;;  %s310_s16 = ssub.s32 %s3357_s28, %s3475_s14 }
   0xc   : > { %p323_p0 = scmp.ne.s32.totalorder %s3353_s27, %s3349_s26  ;;  %p311_p1 = scmp.eq.s32.totalorder %s310_s16, 0 }
   0xd   : > { %p324_p2 = scmp.eq.s32.totalorder %s3471_s29, 1  ;;  %p329_p3 = scmp.ne.s32.totalorder %s3349_s26, %s3345_s25 }
   0xe   : > { %p330_p4 = scmp.eq.s32.totalorder %s2728_s30, 1  ;;  %p2729_p7 = scmp.ge.s32.totalorder %s3357_s28, 1 }
   0xf   : > { %s3486_s17 = scalar_select %p311_p1, %s3353_s27, %s313_s15  }
  0x10   : > { %p3488_p5 = por %p324_p2, %p323_p0  ;;  %p3492_p6 = por %p330_p4, %p329_p3 }
  0x11   : > { %4377 = sst [smem:[#allocation15_spill]] %s3486_s17  ;;  %p337_p8 = scmp.lt.s32.totalorder %s3357_s28, 3 }
  0x12   : > { %s4379_s19 = scalar_select %p3492_p6, 1, 0 }
  0x13   : > { %p3131_p9 = scmp.eq.s32.totalorder %s3471_s29, 0  ;;  %p3499_p10 = pnand %p2729_p7, %p337_p8 }
  0x14   : > { %4380 = sst [smem:[#allocation16_spill]] %s4379_s19  ;;  %s3359_s17 = smov [#allocation5]  }
  0x15   : > { %s4382_s7 = sld [smem:[#allocation18_spill]]  ;;  %p3117_p11 = pneg %p3499_p10 }
  0x16   : > { %s4383_s3 = sld [smem:[#allocation17_spill]]  ;;  %s379_s27 = sshll.u32 %s3359_s17, 4  ;;  %s380_s27 = int_to_ptr.vmem [resolvable:$true] %s379_s27 }
  0x17   : > { %p3513_p12 = pnand %p3131_p9, %p3117_p11  ;;  %s3360_s21 = smov 64  }
  0x18   : > { %s3361_s22 = smov 4   ;;  %s3363_s19 = smov [#allocation7]  }
  0x19   : > { %s396_s25 = sshll.u32 %s3363_s19, 4  ;;  %s397_s25 = int_to_ptr.vmem [resolvable:$true] %s396_s25 }
  0x1b   : > { %s377_s23 = sshll.u32 %s4382_s7, 4  ;;  %s3362_s7 = smov [#allocation2]   ;;  %s378_s23 = int_to_ptr.hbm [resolvable:$true] %s377_s23 }
  0x1c   : > { %s354_s15 = sshll.u32 %s4383_s3, 4  ;;  %s356_s14 = sshll.u32 %s3362_s7, 4  ;;  %s355_s15 = int_to_ptr.hbm [resolvable:$true] %s354_s15  ;;  %s357_s14 = int_to_ptr.vmem [resolvable:$true] %s356_s14 }
  0x1d   : > { %3123 = dma.hbm_to_vmem [thread:$0]  (!%p3513_p12), %s378_s23, 1536, %s380_s27, [#allocation6], %s3360_s21, %s3360_s21, %s3361_s22  }
  0x1e   : > { %s394_s3 = sshll.u32 %s4361_s9, 4  ;;  %429 = sbr.rel (%p3499_p10) target bundleno = 2043 (0x7fb), region = 72  ;;  %s395_s3 = int_to_ptr.hbm [resolvable:$true] %s394_s3 }
  0x1f   : > { %3120 = dma.hbm_to_vmem [thread:$0]  (!%p3513_p12), %s355_s15, 1536, %s357_s14, [#allocation3], %s3360_s21, %s3360_s21, %s3361_s22  }
  0x20   : > { %3126 = dma.hbm_to_vmem [thread:$0]  (!%p3513_p12), %s395_s3, 1536, %s397_s25, [#allocation6], %s3360_s21, %s3360_s21, %s3361_s22  }
  0x23   : > { %3332 = dma.done.wait (%p3131_p9), [#allocation3], 1536  }
  0x24   : > { %3334 = vsyncadd (%p3131_p9), [#allocation3], 4294965760 }
  0x25   : > { %3336 = dma.done.wait (%p3131_p9), [#allocation6], 3072  }
  0x26   : > { %3338 = vsyncadd (%p3131_p9), [#allocation6], 4294964224  ;;  %p483_p13 = scmp.lt.s32.totalorder %s3471_s29, 1  ;;  %v3046_v0 = vld [vmem:[%s4353_s1 + $0x38] sm:$0xff]  ;;  %v3045_v3 = vld [vmem:[%s4353_s1 + $0x30] sm:$0xff]  ;;  %vm493_vm0 = vcmask 1040384  }
  0x27   : > { %v3042_v1 = vld [vmem:[%s4353_s1 + $0x18] sm:$0xff]  ;;  %575 = vmatpush.bf16.msra.mxu0 %v3046_v0  ;;  %v3041_v4 = vld [vmem:[%s4353_s1 + $0x10] sm:$0xff]  ;;  %v3044_v6 = vld [vmem:[%s4353_s1 + $0x28] sm:$0xff]  ;;  %vm567_vm1 = vcmask 523264   ;;  %vm634_vm2 = vcmask 1046528   ;;  %s3364_s25 = smov 64  }
  0x28   : > { %s484_s7 = scalar_select %p483_p13, %s3471_s29, 1  ;;  %v3050_v2 = vld [vmem:[%s4353_s1 + $0x58] sm:$0xff]  ;;  %615 = vmatpush.bf16.msra.mxu1 %v3042_v1  ;;  %v3049_v5 = vld [vmem:[%s4353_s1 + $0x50] sm:$0xff]  ;;  %v3040_v7 = vld [vmem:[%s4353_s1 + $0x8] sm:$0xff]  ;;  %vm530_vm3 = vsmask.f32 7424 }
  0x29   : > { %669 = vmatpush.bf16.msra.mxu3 %v3050_v2  ;;  %v3048_v12 = vld [vmem:[%s4353_s1 + $0x48] sm:$0xff]  ;;  %v3043_v19 = vld [vmem:[%s4353_s1 + $0x20] sm:$0xff]  ;;  %s3365_s27 = smov 80   ;;  %s3366_s14 = smov 112   ;;  %vm860_vm4 = vcmask 1041409   ;;  %vm862_vm5 = vcmask 1043459  }
  0x2a   : > { %s3038_s3 = sshll.u32 %s484_s7, 4  ;;  %v3039_v20 = vld [vmem:[%s4353_s1] sm:$0xff]  ;;  %vm864_vm6 = vcmask 1045509   ;;  %vm866_vm7 = vcmask 1047559   ;;  %s3368_s17 = smov 32   ;;  %vm1118_vm8 = vcmask 1047556  }
  0x2b   : > { %s487_s16 = scalar_lea.vmem %s4352_s0, %s3038_s3  ;;  %576 = vmatpush.bf16.msra.mxu0 %v3045_v3  ;;  %v3047_v24 = vld [vmem:[%s4353_s1 + $0x40] sm:$0xff]  ;;  %s3367_s3 = smov 16   ;;  %vm1652_vm9 = vcmask 64512   ;;  %vm1654_vm10 = vcmask 130048   ;;  %vm1656_vm11 = vcmask 195584   ;;  %vm1658_vm12 = vcmask 261120  }
  0x2c   : > { %v489_v8 = vld [vmem:[%s487_s16] sm:$0xff]  ;;  %v490_v9 = vld [vmem:[%s487_s16 + $0x8] sm:$0xff]  ;;  %616 = vmatpush.bf16.msra.mxu1 %v3041_v4  ;;  %s3369_s19 = smov 96   ;;  %s4371_s20 = smov 48   ;;  %vm1660_vm13 = vcmask 326656   ;;  %vm1662_vm14 = vcmask 392192  }
  0x2d   : > { %v494_v10 = vrot.slane %v489_v8, 7  ;;  %v495_v11 = vrot.slane %v490_v9, 7  ;;  %670 = vmatpush.bf16.msra.mxu3 %v3049_v5  ;;  %v3191_v40 = vld [vmem:[%s4354_s2] ss:$0 sm:$0xff]  ;;  %s3372_s23 = smov 120   ;;  %s3373_s15 = smov 8  }
  0x2e   : > { %s3374_s16 = smov 24   ;;  %s3375_s21 = smov 40   ;;  %vm1664_vm15 = vcmask 457728  }
  0x2f   : > { %v496_v13 = vsel %vm493_vm0, %v494_v10, %v495_v11  ;;  %v500_v14 = vsel %vm493_vm0, 0.0, %v494_v10  ;;  %v501_v15 = vsel %vm493_vm0, %v495_v11, 0.0  ;;  %577 = vmatpush.bf16.msra.mxu0 %v3044_v6  ;;  %s3376_s22 = smov 56   ;;  %s3307_s7 = scalar_lea.hbm %s4365_s13, 2 }
  0x30   : > { %v502_v16 = vpack.c.bf16 %v500_v14, %v500_v14  ;;  %v503_v17 = vpack.c.bf16 %v496_v13, %v496_v13  ;;  %v504_v18 = vpack.c.bf16 %v501_v15, %v501_v15  ;;  %617 = vmatpush.bf16.msra.mxu1 %v3040_v7 }
  0x31   : > { %671 = vmatpush.bf16.msra.mxu3 %v3048_v12 }
  0x32   : > { %v525_v21 = vunpack.c.l.b16 %v502_v16  ;;  %v526_v22 = vunpack.c.l.b16 %v503_v17  ;;  %v527_v23 = vunpack.c.l.b16 %v504_v18 }
  0x33   : > { %578 = vmatpush.bf16.msra.mxu0 %v3043_v19 }
  0x34   : > { %v528_v25 = vpack.c.b16 %v526_v22, %v525_v21  ;;  %v529_v26 = vpack.c.b16 %v527_v23, %v527_v23  ;;  %618 = vmatpush.bf16.msra.mxu1 %v3039_v20 }
  0x35   : > { %672 = vmatpush.bf16.msra.mxu3 %v3047_v24 }
  0x36   : > { %v532_v27 = vshrl.u32 %v528_v25, 16  ;;  %v534_v28 = vshll.u32 %v528_v25, 16  ;;  %v539_v29 = vshll.u32 %v529_v26, 16  ;;  %v635_v30 = vrot.slane %v528_v25, 1 }
  0x37   : > { %v636_v31 = vrot.slane %v529_v26, 1  ;;  %2781 = vmatmul.msk.bf16.vlgmr.msra.gmra.mxu1 %vm567_vm1, %v528_v25 }
  0x38   : > { %v536_v32 = vrot.slane %v534_v28, 1  ;;  %v541_v33 = vrot.slane %v539_v29, 1  ;;  %v3371_v28 = vmov 1934713408  }
  0x39   : > { %v637_v34 = vsel %vm634_vm2, %v635_v30, %v636_v31  ;;  %v1121_v29 = vunpack.c.l.s4 %v3371_v28  ;;  %vm2355_vm2 = vcmask 1044480  }
  0x3a   : > { %v537_v35 = vor.u32 %v536_v32, %v532_v27  ;;  %2806 = vmatmul.msk.bf16.vlgmr.msra.gmra.mxu3 %vm567_vm1, %v637_v34 }
  0x3c   : > { %v542_v36 = vsel %vm530_vm3, %v537_v35, %v541_v33  ;;  %v3711_v35 = vunpack.c.0.s8 %v1121_v29 }
  0x3d   : > { %2764 = vmatmul.msk.bf16.vlgmr.msra.gmra.mxu0 %vm567_vm1, %v542_v36 }
  0xb4   : > { %v620_v38 = vpop.f32.mrf.mxu1 }
  0xba   : > { %v580_v37 = vpop.f32.mrf.mxu0 }
  0xbb   : > { %v621_v39 = vadd.f32 %v620_v38, %v580_v37 }
  0xbc   : > { %v622_v62 = vpop.f32.mrf.mxu1 }
  0xbd   : > { %v674_v41 = vpop.f32.mrf.mxu3 }
  0xbe   : > { %v679_v42 = vadd.f32 %v674_v41, %v621_v39 }
  0xc0   : > { %v685_v43 = vadd.f32 %v3191_v40, %v679_v42 }
  0xc2   : > { %v687_v44 = vmax.f32 %v685_v43, 0.0  ;;  %v582_v61 = vpop.f32.mrf.mxu0 }
  0xc3   : > { %v623_v0 = vadd.f32 %v622_v62, %v582_v61 }
  0xc4   : > { %v691_v45 = vrot.slane %v687_v44, 2  ;;  %v2807_v46 = vrot.slane %v687_v44, 9  ;;  %v693_v52 = vrot.slane %v687_v44, 6  ;;  %v692_v58 = vrot.slane %v687_v44, 4 }
  0xc5   : > { %v676_v63 = vpop.f32.mrf.mxu3 }
  0xc6   : > { %v2808_v47 = vrot.slane %v691_v45, 9  ;;  %v727_v48 = vmax.f32 %v687_v44, %v2807_v46  ;;  %v2810_v56 = vrot.slane %v693_v52, 9  ;;  %v2809_v59 = vrot.slane %v692_v58, 9 }
  0xc7   : > { %v680_v1 = vadd.f32 %v676_v63, %v623_v0 }
  0xc8   : > { %v728_v49 = vmax.f32 %v691_v45, %v2808_v47  ;;  %791 = vrot.lane.b32.xlu0 %v727_v48, %s3364_s25  ;;  %775 = vrot.lane.b32.xlu1 %v727_v48, %s3365_s27  ;;  %v3598_v57 = vmax.f32 %v693_v52, %v2810_v56  ;;  %v3604_v60 = vmax.f32 %v692_v58, %v2809_v59 }
  0xc9   : > { %743 = vrot.lane.b32.xlu2 %v727_v48, %s3366_s14  ;;  %v686_v2 = vadd.f32 %v3191_v40, %v680_v1 }
  0xca   : > { %v859_v50 = vrot.slane %v728_v49, 7  ;;  %v870_v31 = vrot.slane %v3598_v57, 7 }
  0xcb   : > { %v688_v3 = vmax.f32 %v686_v2, 0.0 }
  0xcc   : > { %v861_v51 = vsel %vm860_vm4, %v859_v50, %v727_v48  ;;  %v871_v37 = vsel %vm860_vm4, %v870_v31, %v3604_v60 }
  0xcd   : > { %v863_v53 = vsel %vm862_vm5, %v859_v50, %v861_v51  ;;  %v2811_v4 = vrot.slane %v688_v3, 9  ;;  %v694_v6 = vrot.slane %v688_v3, 2  ;;  %v696_v8 = vrot.slane %v688_v3, 6 }
  0xce   : > { %v865_v54 = vsel %vm864_vm6, %v859_v50, %v863_v53  ;;  %v695_v11 = vrot.slane %v688_v3, 4  ;;  %v872_v44 = vsel %vm862_vm5, %v870_v31, %v871_v37 }
  0xcf   : > { %v3596_v55 = vsel %vm866_vm7, %v859_v50, %v865_v54  ;;  %v3631_v5 = vmax.f32 %v688_v3, %v2811_v4  ;;  %v2812_v7 = vrot.slane %v694_v6, 9  ;;  %v2814_v10 = vrot.slane %v696_v8, 9 }
  0xd0   : > { %839 = vrot.lane.b32.xlu0 %v727_v48, %s3367_s3  ;;  %823 = vrot.lane.b32.xlu1 %v727_v48, %s3368_s17  ;;  %v2813_v13 = vrot.slane %v695_v11, 9  ;;  %v873_v50 = vsel %vm864_vm6, %v870_v31, %v872_v44 }
  0xd1   : > { %759 = vrot.lane.b32.xlu2 %v727_v48, %s3369_s19  ;;  %v3644_v9 = vmax.f32 %v694_v6, %v2812_v7  ;;  %v3652_v12 = vmax.f32 %v696_v8, %v2814_v10 }
  0xd2   : > { %v3660_v15 = vmax.f32 %v695_v11, %v2813_v13 }
  0xd8   : > { %765 = vrot.lane.b32.xlu1 %v3598_v57, %s3369_s19  ;;  %745 = vrot.lane.b32.xlu0 %v728_v49, %s3366_s14 }
  0xd9   : > { %807 = vrot.lane.b32.xlu2 %v727_v48, %s4371_s20 }
  0xe0   : > { %813 = vrot.lane.b32.xlu1 %v3598_v57, %s4371_s20  ;;  %749 = vrot.lane.b32.xlu0 %v3598_v57, %s3366_s14 }
  0xe1   : > { %747 = vrot.lane.b32.xlu2 %v3604_v60, %s3366_s14 }
  0xe8   : > { %793 = vrot.lane.b32.xlu1 %v728_v49, %s3364_s25  ;;  %781 = vrot.lane.b32.xlu0 %v3598_v57, %s3365_s27 }
  0xe9   : > { %777 = vrot.lane.b32.xlu2 %v728_v49, %s3365_s27 }
  0xf0   : > { %795 = vrot.lane.b32.xlu1 %v3604_v60, %s3364_s25  ;;  %761 = vrot.lane.b32.xlu0 %v728_v49, %s3369_s19 }
  0xf1   : > { %779 = vrot.lane.b32.xlu2 %v3604_v60, %s3365_s27 }
  0xf8   : > { %841 = vrot.lane.b32.xlu1 %v728_v49, %s3367_s3  ;;  %763 = vrot.lane.b32.xlu0 %v3604_v60, %s3369_s19 }
  0xf9   : > { %797 = vrot.lane.b32.xlu2 %v3598_v57, %s3364_s25 }
 0x100   : > { %843 = vrot.lane.b32.xlu1 %v3604_v60, %s3367_s3  ;;  %809 = vrot.lane.b32.xlu0 %v728_v49, %s4371_s20 }
 0x101   : > { %845 = vrot.lane.b32.xlu2 %v3598_v57, %s3367_s3 }
 0x108   : > { %811 = vrot.lane.b32.xlu0 %v3604_v60, %s4371_s20  ;;  %767 = vrot.lane.b32.xlu1 %v3631_v5, %s3369_s19 }
 0x109   : > { %825 = vrot.lane.b32.xlu2 %v728_v49, %s3368_s17 }
 0x110   : > { %829 = vrot.lane.b32.xlu0 %v3598_v57, %s3368_s17  ;;  %815 = vrot.lane.b32.xlu1 %v3631_v5, %s4371_s20  ;;  %v874_v57 = vsel %vm866_vm7, %v870_v31, %v873_v50 }
 0x111   : > { %827 = vrot.lane.b32.xlu2 %v3604_v60, %s3368_s17 }
 0x118   : > { %751 = vrot.lane.b32.xlu0 %v3631_v5, %s3366_s14  ;;  %753 = vrot.lane.b32.xlu1 %v3644_v9, %s3366_s14 }
 0x119   : > { %799 = vrot.lane.b32.xlu2 %v3631_v5, %s3364_s25 }
 0x120   : > { %783 = vrot.lane.b32.xlu0 %v3631_v5, %s3365_s27  ;;  %757 = vrot.lane.b32.xlu1 %v3652_v12, %s3366_s14 }
 0x121   : > { %847 = vrot.lane.b32.xlu2 %v3631_v5, %s3367_s3 }
 0x123   : > { %v744_v14 = vpop.permute.xlu2 %743 }
 0x128   : > { %831 = vrot.lane.b32.xlu0 %v3631_v5, %s3368_s17  ;;  %755 = vrot.lane.b32.xlu1 %v3660_v15, %s3366_s14 }
 0x129   : > { %789 = vrot.lane.b32.xlu2 %v3652_v12, %s3365_s27 }
 0x12b   : > { %v3668_v16 = vpop.permute.xlu2 %759 }
 0x130   : > { %773 = vrot.lane.b32.xlu0 %v3652_v12, %s3369_s19  ;;  %785 = vrot.lane.b32.xlu1 %v3644_v9, %s3365_s27 }
 0x131   : > { %769 = vrot.lane.b32.xlu2 %v3644_v9, %s3369_s19 }
 0x133   : > { %v3676_v17 = vpop.permute.xlu2 %807 }
 0x138   : > { %821 = vrot.lane.b32.xlu0 %v3652_v12, %s4371_s20  ;;  %787 = vrot.lane.b32.xlu1 %v3660_v15, %s3365_s27  ;;  %s3377_s27 = smov 98  }
 0x139   : > { %771 = vrot.lane.b32.xlu2 %v3660_v15, %s3369_s19 }
 0x13a   : > { %v792_v18 = vpop.permute.xlu0 %791  ;;  %v776_v19 = vpop.permute.xlu1 %775 }
 0x13b   : > { %v748_v20 = vpop.permute.xlu2 %747 }
 0x140   : > { %801 = vrot.lane.b32.xlu0 %v3644_v9, %s3364_s25  ;;  %805 = vrot.lane.b32.xlu1 %v3652_v12, %s3364_s25 }
 0x141   : > { %817 = vrot.lane.b32.xlu2 %v3644_v9, %s4371_s20 }
 0x142   : > { %v3690_v21 = vpop.permute.xlu0 %839  ;;  %v3692_v22 = vpop.permute.xlu1 %823 }
 0x143   : > { %v778_v23 = vpop.permute.xlu2 %777 }
 0x144   : > { %v947_v46 = vrot.slane %v778_v23, 7 }
 0x146   : > { %v948_v54 = vsel %vm860_vm4, %v947_v46, %v776_v19 }
 0x147   : > { %v949_v61 = vsel %vm862_vm5, %v947_v46, %v948_v54 }
 0x148   : > { %803 = vrot.lane.b32.xlu0 %v3660_v15, %s3364_s25  ;;  %853 = vrot.lane.b32.xlu1 %v3652_v12, %s3367_s3  ;;  %v950_v3 = vsel %vm864_vm6, %v947_v46, %v949_v61 }
 0x149   : > { %819 = vrot.lane.b32.xlu2 %v3660_v15, %s4371_s20  ;;  %v951_v11 = vsel %vm866_vm7, %v947_v46, %v950_v3 }
 0x14a   : > { %v3700_v24 = vpop.permute.xlu1 %765  ;;  %v746_v25 = vpop.permute.xlu0 %745  ;;  %v1126_v28 = vrot.slane %v951_v11, 4 }
 0x14b   : > { %v780_v26 = vpop.permute.xlu2 %779  ;;  %v891_v27 = vrot.slane %v746_v25, 7 }
 0x14d   : > { %v892_v30 = vsel %vm860_vm4, %v891_v27, %v744_v14 }
 0x14e   : > { %v893_v32 = vsel %vm862_vm5, %v891_v27, %v892_v30 }
 0x14f   : > { %v894_v33 = vsel %vm864_vm6, %v891_v27, %v893_v32 }
 0x150   : > { %v895_v34 = vsel %vm866_vm7, %v891_v27, %v894_v33  ;;  %849 = vrot.lane.b32.xlu0 %v3644_v9, %s3367_s3  ;;  %833 = vrot.lane.b32.xlu1 %v3644_v9, %s3368_s17 }
 0x151   : > { %v1117_v36 = vrot.slane %v895_v34, 4  ;;  %837 = vrot.lane.b32.xlu2 %v3652_v12, %s3368_s17 }
 0x152   : > { %v3717_v38 = vpop.permute.xlu1 %813  ;;  %v750_v39 = vpop.permute.xlu0 %749 }
 0x153   : > { %v798_v40 = vpop.permute.xlu2 %797  ;;  %v898_v41 = vrot.slane %v750_v39, 7  ;;  %v1119_v42 = vsel %vm1118_vm8, %v1117_v36, %v3596_v55 }
 0x154   : > { %v3722_v43 = vperm.slane %v1119_v42, %v3711_v35  ;;  %v982_v6 = vrot.slane %v798_v40, 7 }
 0x155   : > { %v899_v45 = vsel %vm860_vm4, %v898_v41, %v748_v20 }
 0x156   : > { %v900_v47 = vsel %vm862_vm5, %v898_v41, %v899_v45  ;;  %v1124_v48 = vrot.slane %v3722_v43, 4 }
 0x157   : > { %v901_v49 = vsel %vm864_vm6, %v898_v41, %v900_v47 }
 0x158   : > { %v902_v51 = vsel %vm866_vm7, %v898_v41, %v901_v49  ;;  %851 = vrot.lane.b32.xlu0 %v3660_v15, %s3367_s3  ;;  %835 = vrot.lane.b32.xlu1 %v3660_v15, %s3368_s17  ;;  %v3736_v52 = vsel %vm1118_vm8, 0.0, %v1124_v48 }
 0x159   : > { %v1150_v53 = vrot.slane %v902_v51, 4  ;;  %1286 = vrot.lane.b32.xlu2 %v3736_v52, %s3372_s23 }
 0x15a   : > { %v794_v55 = vpop.permute.xlu1 %793  ;;  %v782_v56 = vpop.permute.xlu0 %781 }
 0x15b   : > { %v975_v58 = vrot.slane %v794_v55, 7  ;;  %v846_v59 = vpop.permute.xlu2 %845  ;;  %v1151_v60 = vsel %vm1118_vm8, %v1150_v53, %v874_v57  ;;  %v954_v63 = vrot.slane %v782_v56, 7 }
 0x15c   : > { %v3747_v1 = vperm.slane %v1151_v60, %v3711_v35  ;;  %v1066_v61 = vrot.slane %v846_v59, 7 }
 0x15d   : > { %v976_v62 = vsel %vm860_vm4, %v975_v58, %v792_v18  ;;  %v955_v7 = vsel %vm860_vm4, %v954_v63, %v780_v26 }
 0x15e   : > { %v977_v0 = vsel %vm862_vm5, %v975_v58, %v976_v62  ;;  %v1156_v19 = vrot.slane %v3747_v1, 4  ;;  %v956_v20 = vsel %vm862_vm5, %v954_v63, %v955_v7 }
 0x15f   : > { %v978_v2 = vsel %vm864_vm6, %v975_v58, %v977_v0  ;;  %v957_v32 = vsel %vm864_vm6, %v954_v63, %v956_v20 }
 0x160   : > { %v3752_v4 = vsel %vm866_vm7, %v975_v58, %v978_v2  ;;  %1278 = vrot.lane.b32.xlu0 %v3722_v43, %s3372_s23  ;;  %1294 = vrot.lane.b32.xlu1 %v3747_v1, %s3372_s23  ;;  %v3775_v36 = vsel %vm1118_vm8, 0.0, %v1156_v19  ;;  %v958_v41 = vsel %vm866_vm7, %v954_v63, %v957_v32 }
 0x162   : > { %v796_v8 = vpop.permute.xlu1 %795  ;;  %v762_v10 = vpop.permute.xlu0 %761 }
 0x163   : > { %v983_v13 = vsel %vm860_vm4, %v982_v6, %v796_v8  ;;  %v826_v14 = vpop.permute.xlu2 %825  ;;  %v919_v18 = vrot.slane %v762_v10, 7 }
 0x164   : > { %v984_v23 = vsel %vm862_vm5, %v982_v6, %v983_v13  ;;  %v1031_v25 = vrot.slane %v826_v14, 7 }
 0x165   : > { %v985_v27 = vsel %vm864_vm6, %v982_v6, %v984_v23  ;;  %v920_v26 = vsel %vm860_vm4, %v919_v18, %v3668_v16  ;;  %v1010_v23 = vrot.slane %v3717_v38, 7 }
 0x166   : > { %v1032_v29 = vsel %vm860_vm4, %v1031_v25, %v3692_v22  ;;  %v921_v30 = vsel %vm862_vm5, %v919_v18, %v920_v26  ;;  %v986_v31 = vsel %vm866_vm7, %v982_v6, %v985_v27  ;;  %v926_v22 = vrot.slane %v3700_v24, 7 }
 0x167   : > { %v1033_v33 = vsel %vm862_vm5, %v1031_v25, %v1032_v29  ;;  %v922_v34 = vsel %vm864_vm6, %v919_v18, %v921_v30  ;;  %v1158_v24 = vrot.slane %v958_v41, 4 }
 0x168   : > { %v1034_v37 = vsel %vm864_vm6, %v1031_v25, %v1033_v33  ;;  %v923_v16 = vsel %vm866_vm7, %v919_v18, %v922_v34  ;;  %1302 = vrot.lane.b32.xlu0 %v3775_v36, %s3372_s23 }
 0x169   : > { %v1035_v39 = vsel %vm866_vm7, %v1031_v25, %v1034_v37  ;;  %v1127_v40 = vsel %vm1118_vm8, %v1126_v28, %v923_v16 }
 0x16a   : > { %v842_v42 = vpop.permute.xlu1 %841  ;;  %v764_v44 = vpop.permute.xlu0 %763  ;;  %v3786_v45 = vperm.slane %v1127_v40, %v3711_v35 }
 0x16b   : > { %v1059_v46 = vrot.slane %v842_v42, 7  ;;  %v828_v47 = vpop.permute.xlu2 %827  ;;  %v927_v48 = vsel %vm860_vm4, %v926_v22, %v764_v44 }
 0x16c   : > { %v928_v49 = vsel %vm862_vm5, %v926_v22, %v927_v48  ;;  %v1132_v50 = vrot.slane %v3786_v45, 4 }
 0x16d   : > { %v1060_v51 = vsel %vm860_vm4, %v1059_v46, %v3690_v21  ;;  %v929_v53 = vsel %vm864_vm6, %v926_v22, %v928_v49 }
 0x16e   : > { %v1061_v54 = vsel %vm862_vm5, %v1059_v46, %v1060_v51  ;;  %v930_v55 = vsel %vm866_vm7, %v926_v22, %v929_v53  ;;  %v3797_v56 = vsel %vm1118_vm8, 0.0, %v1132_v50 }
 0x16f   : > { %v1062_v57 = vsel %vm864_vm6, %v1059_v46, %v1061_v54  ;;  %1288 = vrot.lane.b32.xlu1 %v3797_v56, %s3372_s23  ;;  %v1159_v58 = vsel %vm1118_vm8, %v1158_v24, %v930_v55 }
 0x170   : > { %v1063_v60 = vsel %vm866_vm7, %v1059_v46, %v1062_v57  ;;  %v3805_v21 = vperm.slane %v1159_v58, %v3711_v35 }
 0x171   : > { %v1142_v62 = vrot.slane %v1063_v60, 4 }
 0x172   : > { %v844_v63 = vpop.permute.xlu1 %843  ;;  %v810_v0 = vpop.permute.xlu0 %809  ;;  %v1164_v2 = vrot.slane %v3805_v21, 4 }
 0x173   : > { %v1067_v3 = vsel %vm860_vm4, %v1066_v61, %v844_v63  ;;  %v1003_v6 = vrot.slane %v810_v0, 7  ;;  %v3809_v7 = vpop.permute.xlu2 %799  ;;  %v3812_v8 = vsel %vm1118_vm8, %v1142_v62, %v1035_v39  ;;  %v884_v63 = vrot.slane %v3652_v12, 7 }
 0x174   : > { %v1068_v10 = vsel %vm862_vm5, %v1066_v61, %v1067_v3  ;;  %v3816_v11 = vsel %vm1118_vm8, 0.0, %v1164_v2 }
 0x175   : > { %v1069_v59 = vsel %vm864_vm6, %v1066_v61, %v1068_v10  ;;  %v1004_v13 = vsel %vm860_vm4, %v1003_v6, %v3676_v17  ;;  %1304 = vrot.lane.b32.xlu2 %v3816_v11, %s3372_s23  ;;  %v885_v3 = vsel %vm860_vm4, %v884_v63, %v3660_v15 }
 0x176   : > { %v1070_v14 = vsel %vm866_vm7, %v1066_v61, %v1069_v59  ;;  %v1005_v18 = vsel %vm862_vm5, %v1003_v6, %v1004_v13  ;;  %v886_v13 = vsel %vm862_vm5, %v884_v63, %v885_v3 }
 0x177   : > { %v1006_v19 = vsel %vm864_vm6, %v1003_v6, %v1005_v18  ;;  %v1174_v41 = vrot.slane %v1070_v14, 4 }
 0x178   : > { %v1007_v20 = vsel %vm866_vm7, %v1003_v6, %v1006_v19 }
 0x179   : > { %v1134_v25 = vrot.slane %v1007_v20, 4 }
 0x17a   : > { %v812_v27 = vpop.permute.xlu0 %811  ;;  %v768_v26 = vpop.permute.xlu1 %767 }
 0x17b   : > { %v1011_v28 = vsel %vm860_vm4, %v1010_v23, %v812_v27  ;;  %v3831_v17 = vsel %vm1118_vm8, %v1134_v25, %v3752_v4  ;;  %v3835_v32 = vpop.permute.xlu2 %847  ;;  %v877_v4 = vrot.slane %v3644_v9, 7 }
 0x17c   : > { %v1012_v29 = vsel %vm862_vm5, %v1010_v23, %v1011_v28 }
 0x17d   : > { %v1013_v30 = vsel %vm864_vm6, %v1010_v23, %v1012_v29 }
 0x17e   : > { %v1014_v33 = vsel %vm866_vm7, %v1010_v23, %v1013_v30  ;;  %v887_v23 = vsel %vm864_vm6, %v884_v63, %v886_v13 }
 0x17f   : > { %v1166_v34 = vrot.slane %v1014_v33, 4  ;;  %v888_v28 = vsel %vm866_vm7, %v884_v63, %v887_v23 }
 0x181   : > { %v3839_v38 = vsel %vm1118_vm8, %v1166_v34, %v986_v31  ;;  %v878_v31 = vsel %vm860_vm4, %v877_v4, %v3631_v5 }
 0x182   : > { %v830_v37 = vpop.permute.xlu0 %829  ;;  %v3841_v16 = vpop.permute.xlu1 %815 }
 0x183   : > { %v1038_v22 = vrot.slane %v830_v37, 7  ;;  %v790_v44 = vpop.permute.xlu2 %789 }
 0x185   : > { %v1039_v39 = vsel %vm860_vm4, %v1038_v22, %v828_v47  ;;  %v879_v47 = vsel %vm862_vm5, %v877_v4, %v878_v31 }
 0x186   : > { %v1040_v40 = vsel %vm862_vm5, %v1038_v22, %v1039_v39  ;;  %v880_v54 = vsel %vm864_vm6, %v877_v4, %v879_v47  ;;  %v968_v47 = vrot.slane %v790_v44, 7 }
 0x187   : > { %v1041_v42 = vsel %vm864_vm6, %v1038_v22, %v1040_v40  ;;  %v881_v61 = vsel %vm866_vm7, %v877_v4, %v880_v54 }
 0x188   : > { %v1042_v46 = vsel %vm866_vm7, %v1038_v22, %v1041_v42 }
 0x189   : > { %v3851_v48 = vsel %vm1118_vm8, %v1174_v41, %v1042_v46 }
 0x18a   : > { %v752_v49 = vpop.permute.xlu0 %751  ;;  %v754_v50 = vpop.permute.xlu1 %753 }
 0x18b   : > { %v905_v24 = vrot.slane %v754_v50, 7  ;;  %v770_v57 = vpop.permute.xlu2 %769 }
 0x18c   : > { %v933_v20 = vrot.slane %v770_v57, 7 }
 0x18d   : > { %v906_v9 = vsel %vm860_vm4, %v905_v24, %v752_v49 }
 0x18e   : > { %v907_v51 = vsel %vm862_vm5, %v905_v24, %v906_v9  ;;  %v934_v29 = vsel %vm860_vm4, %v933_v20, %v768_v26 }
 0x18f   : > { %v908_v53 = vsel %vm864_vm6, %v905_v24, %v907_v51  ;;  %v935_v4 = vsel %vm862_vm5, %v933_v20, %v934_v29 }
 0x190   : > { %v909_v55 = vsel %vm866_vm7, %v905_v24, %v908_v53  ;;  %v936_v31 = vsel %vm864_vm6, %v933_v20, %v935_v4  ;;  %v3952_v4 = vperm.slane %v3839_v38, %v3711_v35 }
 0x191   : > { %v1182_v5 = vrot.slane %v909_v55, 4  ;;  %v937_v57 = vsel %vm866_vm7, %v933_v20, %v936_v31 }
 0x192   : > { %v784_v58 = vpop.permute.xlu0 %783  ;;  %v758_v60 = vpop.permute.xlu1 %757  ;;  %v1172_v38 = vrot.slane %v3952_v4, 4 }
 0x193   : > { %v1183_v62 = vsel %vm1118_vm8, %v1182_v5, %v881_v61  ;;  %v912_v10 = vrot.slane %v758_v60, 7  ;;  %v772_v18 = vpop.permute.xlu2 %771  ;;  %v3910_v60 = vperm.slane %v3831_v17, %v3711_v35 }
 0x194   : > { %v3863_v0 = vperm.slane %v1183_v62, %v3711_v35 }
 0x196   : > { %1310 = vrot.lane.b32.xlu2 %v3863_v0, %s3372_s23  ;;  %v1188_v2 = vrot.slane %v3863_v0, 4 }
 0x198   : > { %v3871_v6 = vsel %vm1118_vm8, 0.0, %v1188_v2 }
 0x199   : > { %1318 = vrot.lane.b32.xlu1 %v3871_v6, %s3372_s23 }
 0x19a   : > { %v3875_v59 = vpop.permute.xlu0 %831  ;;  %v756_v12 = vpop.permute.xlu1 %755 }
 0x19b   : > { %v913_v14 = vsel %vm860_vm4, %v912_v10, %v756_v12  ;;  %v818_v42 = vpop.permute.xlu2 %817  ;;  %v1140_v12 = vrot.slane %v3910_v60, 4 }
 0x19c   : > { %v914_v19 = vsel %vm862_vm5, %v912_v10, %v913_v14  ;;  %v1017_v9 = vrot.slane %v818_v42, 7 }
 0x19d   : > { %v915_v15 = vsel %vm864_vm6, %v912_v10, %v914_v19 }
 0x19e   : > { %v916_v25 = vsel %vm866_vm7, %v912_v10, %v915_v15  ;;  %v1018_v62 = vsel %vm860_vm4, %v1017_v9, %v3841_v16 }
 0x19f   : > { %v1214_v27 = vrot.slane %v916_v25, 4  ;;  %v1019_v13 = vsel %vm862_vm5, %v1017_v9, %v1018_v62 }
 0x1a0   : > { %v1020_v25 = vsel %vm864_vm6, %v1017_v9, %v1019_v13 }
 0x1a1   : > { %v1215_v30 = vsel %vm1118_vm8, %v1214_v27, %v888_v28  ;;  %v3937_v28 = vsel %vm1118_vm8, 0.0, %v1140_v12 }
 0x1a2   : > { %v774_v33 = vpop.permute.xlu0 %773  ;;  %v786_v34 = vpop.permute.xlu1 %785  ;;  %v3887_v37 = vperm.slane %v1215_v30, %v3711_v35 }
 0x1a3   : > { %v940_v22 = vrot.slane %v774_v33, 7  ;;  %v961_v39 = vrot.slane %v786_v34, 7  ;;  %v820_v14 = vpop.permute.xlu2 %819  ;;  %v1021_v34 = vsel %vm866_vm7, %v1017_v9, %v1020_v25 }
 0x1a4   : > { %1326 = vrot.lane.b32.xlu0 %v3887_v37, %s3372_s23  ;;  %v1220_v40 = vrot.slane %v3887_v37, 4 }
 0x1a5   : > { %v962_v41 = vsel %vm860_vm4, %v961_v39, %v784_v58  ;;  %v941_v49 = vsel %vm860_vm4, %v940_v22, %v772_v18 }
 0x1a6   : > { %v963_v26 = vsel %vm862_vm5, %v961_v39, %v962_v41  ;;  %v3896_v46 = vsel %vm1118_vm8, 0.0, %v1220_v40  ;;  %v942_v53 = vsel %vm862_vm5, %v940_v22, %v941_v49 }
 0x1a7   : > { %v964_v50 = vsel %vm864_vm6, %v961_v39, %v963_v26  ;;  %1334 = vrot.lane.b32.xlu2 %v3896_v46, %s3372_s23  ;;  %v943_v63 = vsel %vm864_vm6, %v940_v22, %v942_v53  ;;  %v1198_v26 = vrot.slane %v1021_v34, 4 }
 0x1a8   : > { %v965_v24 = vsel %vm866_vm7, %v961_v39, %v964_v50  ;;  %v944_v16 = vsel %vm866_vm7, %v940_v22, %v943_v63 }
 0x1a9   : > { %v1190_v51 = vrot.slane %v965_v24, 4 }
 0x1aa   : > { %v822_v54 = vpop.permute.xlu0 %821  ;;  %v788_v55 = vpop.permute.xlu1 %787 }
 0x1ab   : > { %v969_v5 = vsel %vm860_vm4, %v968_v47, %v788_v55  ;;  %v1191_v58 = vsel %vm1118_vm8, %v1190_v51, %v937_v57  ;;  %v1024_v3 = vrot.slane %v822_v54, 7  ;;  %v838_v62 = vpop.permute.xlu2 %837 }
 0x1ac   : > { %v970_v61 = vsel %vm862_vm5, %v968_v47, %v969_v5  ;;  %1296 = vrot.lane.b32.xlu0 %v3805_v21, %s3372_s23  ;;  %v3916_v44 = vperm.slane %v1191_v58, %v3711_v35  ;;  %v3975_v5 = vsel %vm1118_vm8, 0.0, %v1172_v38 }
 0x1ad   : > { %v971_v2 = vsel %vm864_vm6, %v968_v47, %v970_v61  ;;  %v1025_v19 = vsel %vm860_vm4, %v1024_v3, %v820_v14 }
 0x1ae   : > { %v972_v10 = vsel %vm866_vm7, %v968_v47, %v971_v2  ;;  %1312 = vrot.lane.b32.xlu1 %v3916_v44, %s3372_s23  ;;  %v1026_v30 = vsel %vm862_vm5, %v1024_v3, %v1025_v19 }
 0x1af   : > { %v1222_v17 = vrot.slane %v972_v10, 4  ;;  %1280 = vrot.lane.b32.xlu2 %v3786_v45, %s3372_s23  ;;  %v1027_v41 = vsel %vm864_vm6, %v1024_v3, %v1026_v30 }
 0x1b0   : > { %v1028_v24 = vsel %vm866_vm7, %v1024_v3, %v1027_v41 }
 0x1b1   : > { %v1223_v18 = vsel %vm1118_vm8, %v1222_v17, %v944_v16  ;;  %v1230_v55 = vrot.slane %v1028_v24, 4 }
 0x1b2   : > { %v802_v20 = vpop.permute.xlu0 %801  ;;  %v806_v15 = vpop.permute.xlu1 %805  ;;  %v3933_v23 = vperm.slane %v1223_v18, %v3711_v35 }
 0x1b3   : > { %v989_v27 = vrot.slane %v802_v20, 7  ;;  %v996_v31 = vrot.slane %v806_v15, 7  ;;  %v4002_v20 = vperm.slane %v3812_v8, %v3711_v35 }
 0x1b4   : > { %1290 = vrot.lane.b32.xlu0 %v3937_v28, %s3372_s23  ;;  %v1228_v29 = vrot.slane %v3933_v23, 4 }
 0x1b5   : > { %v990_v33 = vsel %vm860_vm4, %v989_v27, %v3809_v7  ;;  %v1196_v7 = vrot.slane %v3916_v44, 4 }
 0x1b6   : > { %v991_v22 = vsel %vm862_vm5, %v989_v27, %v990_v33  ;;  %v3948_v39 = vsel %vm1118_vm8, 0.0, %v1228_v29 }
 0x1b7   : > { %v992_v40 = vsel %vm864_vm6, %v989_v27, %v991_v22  ;;  %1328 = vrot.lane.b32.xlu2 %v3933_v23, %s3372_s23  ;;  %1336 = vrot.lane.b32.xlu1 %v3948_v39, %s3372_s23  ;;  %v3966_v9 = vsel %vm1118_vm8, 0.0, %v1196_v7  ;;  %v1148_v22 = vrot.slane %v4002_v20, 4 }
 0x1b8   : > { %v993_v42 = vsel %vm866_vm7, %v989_v27, %v992_v40  ;;  %v1052_v27 = vrot.slane %v838_v62, 7  ;;  %v4016_v40 = vperm.slane %v3851_v48, %v3711_v35 }
 0x1b9   : > { %v1199_v51 = vsel %vm1118_vm8, %v1198_v26, %v993_v42 }
 0x1ba   : > { %v804_v49 = vpop.permute.xlu0 %803  ;;  %v854_v50 = vpop.permute.xlu1 %853  ;;  %v3978_v58 = vperm.slane %v1199_v51, %v3711_v35 }
 0x1bb   : > { %v997_v47 = vsel %vm860_vm4, %v996_v31, %v804_v49  ;;  %v1080_v29 = vrot.slane %v854_v50, 7 }
 0x1bc   : > { %v998_v53 = vsel %vm862_vm5, %v996_v31, %v997_v47  ;;  %1320 = vrot.lane.b32.xlu0 %v3966_v9, %s3372_s23  ;;  %v1204_v3 = vrot.slane %v3978_v58, 4  ;;  %v4032_v47 = vsel %vm1118_vm8, 0.0, %v1148_v22 }
 0x1bd   : > { %v999_v54 = vsel %vm864_vm6, %v996_v31, %v998_v53 }
 0x1be   : > { %v1000_v57 = vsel %vm866_vm7, %v996_v31, %v999_v54  ;;  %v3998_v19 = vsel %vm1118_vm8, 0.0, %v1204_v3  ;;  %v1287_v31 = vpop.permute.xlu2 %1286 }
 0x1bf   : > { %1298 = vrot.lane.b32.xlu2 %v3952_v4, %s3372_s23  ;;  %1306 = vrot.lane.b32.xlu1 %v3975_v5, %s3372_s23  ;;  %v1231_v61 = vsel %vm1118_vm8, %v1230_v55, %v1000_v57  ;;  %v1378_v53 = vmax.f32 %v3736_v52, %v1287_v31  ;;  %v1180_v55 = vrot.slane %v4016_v40, 4 }
 0x1c0   : > { %v3987_v12 = vperm.slane %v1231_v61, %v3711_v35 }
 0x1c1   : > { %v1406_v52 = vrot.slane %v1378_v53, 4 }
 0x1c2   : > { %v850_v63 = vpop.permute.xlu0 %849  ;;  %v834_v2 = vpop.permute.xlu1 %833 }
 0x1c3   : > { %v1073_v10 = vrot.slane %v850_v63, 7  ;;  %v1045_v17 = vrot.slane %v834_v2, 7 }
 0x1c4   : > { %1314 = vrot.lane.b32.xlu0 %v3978_v58, %s3372_s23 }
 0x1c5   : > { %v1074_v13 = vsel %vm860_vm4, %v1073_v10, %v3835_v32  ;;  %v1046_v16 = vsel %vm860_vm4, %v1045_v17, %v3875_v59  ;;  %v1236_v32 = vrot.slane %v3987_v12, 4 }
 0x1c6   : > { %v1075_v14 = vsel %vm862_vm5, %v1073_v10, %v1074_v13  ;;  %v1047_v18 = vsel %vm862_vm5, %v1045_v17, %v1046_v16 }
 0x1c7   : > { %v1076_v15 = vsel %vm864_vm6, %v1073_v10, %v1075_v14  ;;  %v1048_v25 = vsel %vm864_vm6, %v1045_v17, %v1047_v18  ;;  %1322 = vrot.lane.b32.xlu2 %v3998_v19, %s3372_s23  ;;  %1282 = vrot.lane.b32.xlu1 %v3910_v60, %s3372_s23  ;;  %v4021_v42 = vsel %vm1118_vm8, 0.0, %v1236_v32 }
 0x1c8   : > { %v1077_v59 = vsel %vm866_vm7, %v1073_v10, %v1076_v15  ;;  %v1049_v8 = vsel %vm866_vm7, %v1045_v17, %v1048_v25  ;;  %v4051_v10 = vsel %vm1118_vm8, 0.0, %v1180_v55 }
 0x1c9   : > { %v1206_v30 = vrot.slane %v1077_v59, 4 }
 0x1ca   : > { %v852_v33 = vpop.permute.xlu0 %851  ;;  %v836_v34 = vpop.permute.xlu1 %835 }
 0x1cb   : > { %v1081_v7 = vsel %vm860_vm4, %v1080_v29, %v852_v33  ;;  %v1053_v41 = vsel %vm860_vm4, %v1052_v27, %v836_v34  ;;  %v1207_v26 = vsel %vm1118_vm8, %v1206_v30, %v1049_v8 }
 0x1cc   : > { %v1082_v49 = vsel %vm862_vm5, %v1080_v29, %v1081_v7  ;;  %v1054_v50 = vsel %vm862_vm5, %v1052_v27, %v1053_v41  ;;  %1338 = vrot.lane.b32.xlu0 %v4021_v42, %s3372_s23  ;;  %v4035_v51 = vperm.slane %v1207_v26, %v3711_v35 }
 0x1cd   : > { %v1083_v48 = vsel %vm864_vm6, %v1080_v29, %v1082_v49  ;;  %v1055_v38 = vsel %vm864_vm6, %v1052_v27, %v1054_v50 }
 0x1ce   : > { %v1084_v24 = vsel %vm866_vm7, %v1080_v29, %v1083_v48  ;;  %v1056_v57 = vsel %vm866_vm7, %v1052_v27, %v1055_v38  ;;  %v1212_v2 = vrot.slane %v4035_v51, 4 }
 0x1cf   : > { %v1238_v54 = vrot.slane %v1084_v24, 4  ;;  %1292 = vrot.lane.b32.xlu2 %v4032_v47, %s3372_s23  ;;  %1330 = vrot.lane.b32.xlu1 %v3987_v12, %s3372_s23 }
 0x1d0   : > { %v4062_v18 = vsel %vm1118_vm8, 0.0, %v1212_v2 }
 0x1d1   : > { %v1239_v61 = vsel %vm1118_vm8, %v1238_v54, %v1056_v57 }
 0x1d2   : > { %v1279_v62 = vpop.permute.xlu0 %1278  ;;  %v4046_v63 = vperm.slane %v1239_v61, %v3711_v35 }
 0x1d3   : > { %v1374_v3 = vmax.f32 %v3722_v43, %v1279_v62  ;;  %v1295_v43 = vpop.permute.xlu1 %1294 }
 0x1d4   : > { %1308 = vrot.lane.b32.xlu0 %v4051_v10, %s3372_s23  ;;  %v1244_v17 = vrot.slane %v4046_v63, 4  ;;  %v1382_v32 = vmax.f32 %v3747_v1, %v1295_v43 }
 0x1d5   : > { %v1407_v13 = vsel %vm1118_vm8, %v1406_v52, %v1374_v3 }
 0x1d6   : > { %v1411_v16 = vperm.slane %v1407_v13, %v3711_v35  ;;  %v4059_v14 = vsel %vm1118_vm8, 0.0, %v1244_v17 }
 0x1d7   : > { %1340 = vrot.lane.b32.xlu2 %v4059_v14, %s3372_s23  ;;  %1324 = vrot.lane.b32.xlu1 %v4062_v18, %s3372_s23 }
 0x1d8   : > { %1538 = vst [vmem:[#allocation1] ss:$4 sm:$0xff] %v1411_v16  ;;  %v1412_v53 = vrot.slane %v1411_v16, 4 }
 0x1da   : > { %v1303_v15 = vpop.permute.xlu0 %1302  ;;  %v1413_v62 = vsel %vm1118_vm8, 0.0, %v1412_v53 }
 0x1db   : > { %v1386_v25 = vmax.f32 %v3775_v36, %v1303_v15  ;;  %v1305_v36 = vpop.permute.xlu2 %1304 }
 0x1dc   : > { %1284 = vrot.lane.b32.xlu0 %v4002_v20, %s3372_s23  ;;  %v1387_v3 = vmax.f32 %v3816_v11, %v1305_v36 }
 0x1dd   : > { %v1414_v59 = vrot.slane %v1386_v25, 4 }
 0x1df   : > { %v1415_v27 = vsel %vm1118_vm8, %v1414_v59, %v1382_v32  ;;  %1316 = vrot.lane.b32.xlu2 %v4035_v51, %s3372_s23  ;;  %1300 = vrot.lane.b32.xlu1 %v4016_v40, %s3372_s23  ;;  %v1446_v32 = vrot.slane %v1387_v3, 4 }
 0x1e0   : > { %v1419_v29 = vperm.slane %v1415_v27, %v3711_v35 }
 0x1e1   : > { %v1289_v30 = vpop.permute.xlu1 %1288 }
 0x1e2   : > { %1540 = vst [vmem:[#allocation1 + $0x1] ss:$4 sm:$0xff] %v1419_v29  ;;  %v1420_v54 = vrot.slane %v1419_v29, 4 }
 0x1e4   : > { %1332 = vrot.lane.b32.xlu0 %v4046_v63, %s3372_s23  ;;  %v1421_v52 = vsel %vm1118_vm8, 0.0, %v1420_v54  ;;  %s3378_s23 = smov 108  }
 0x1f0   : > { %v1311_v8 = vpop.permute.xlu2 %1310 }
 0x1f1   : > { %v1390_v34 = vmax.f32 %v3863_v0, %v1311_v8 }
 0x201   : > { %v1335_v7 = vpop.permute.xlu2 %1334 }
 0x202   : > { %v1402_v31 = vmax.f32 %v3896_v46, %v1335_v7 }
 0x204   : > { %v1430_v50 = vrot.slane %v1402_v31, 4 }
 0x209   : > { %v1281_v38 = vpop.permute.xlu2 %1280 }
 0x20a   : > { %v1375_v13 = vmax.f32 %v3786_v45, %v1281_v38 }
 0x20b   : > { %v1319_v33 = vpop.permute.xlu1 %1318 }
 0x20c   : > { %v1394_v1 = vmax.f32 %v3871_v6, %v1319_v33 }
 0x20e   : > { %v1422_v22 = vrot.slane %v1394_v1, 4 }
 0x210   : > { %v1423_v41 = vsel %vm1118_vm8, %v1422_v22, %v1390_v34 }
 0x211   : > { %v1427_v26 = vperm.slane %v1423_v41, %v3711_v35  ;;  %v1329_v46 = vpop.permute.xlu2 %1328 }
 0x212   : > { %v1399_v29 = vmax.f32 %v3933_v23, %v1329_v46 }
 0x213   : > { %1542 = vst [vmem:[#allocation1 + $0x2] ss:$4 sm:$0xff] %v1427_v26  ;;  %v1428_v57 = vrot.slane %v1427_v26, 4 }
 0x215   : > { %v1429_v17 = vsel %vm1118_vm8, 0.0, %v1428_v57 }
 0x216   : > { %v1327_v49 = vpop.permute.xlu0 %1326 }
 0x217   : > { %v1398_v48 = vmax.f32 %v3887_v37, %v1327_v49  ;;  %v1379_v37 = vmax.f32 %v3797_v56, %v1289_v30 }
 0x219   : > { %v1431_v24 = vsel %vm1118_vm8, %v1430_v50, %v1398_v48  ;;  %v1438_v25 = vrot.slane %v1379_v37, 4  ;;  %v1299_v30 = vpop.permute.xlu2 %1298 }
 0x21a   : > { %v1435_v6 = vperm.slane %v1431_v24, %v3711_v35 }
 0x21b   : > { %v1439_v56 = vsel %vm1118_vm8, %v1438_v25, %v1375_v13  ;;  %v1384_v13 = vmax.f32 %v3952_v4, %v1299_v30 }
 0x21c   : > { %1544 = vst [vmem:[#allocation1 + $0x3] ss:$4 sm:$0xff] %v1435_v6  ;;  %v1436_v61 = vrot.slane %v1435_v6, 4  ;;  %v1443_v45 = vperm.slane %v1439_v56, %v3711_v35 }
 0x21e   : > { %v1297_v0 = vpop.permute.xlu0 %1296  ;;  %v1437_v16 = vsel %vm1118_vm8, 0.0, %v1436_v61  ;;  %v1444_v38 = vrot.slane %v1443_v45, 4 }
 0x21f   : > { %v1383_v15 = vmax.f32 %v3805_v21, %v1297_v0 }
 0x220   : > { %v1313_v55 = vpop.permute.xlu1 %1312  ;;  %v1445_v53 = vsel %vm1118_vm8, 0.0, %v1444_v38 }
 0x221   : > { %v1447_v11 = vsel %vm1118_vm8, %v1446_v32, %v1383_v15  ;;  %v1391_v23 = vmax.f32 %v3916_v44, %v1313_v55  ;;  %v1323_v49 = vpop.permute.xlu2 %1322 }
 0x222   : > { %v1451_v33 = vperm.slane %v1447_v11, %v3711_v35  ;;  %v1396_v57 = vmax.f32 %v3998_v19, %v1323_v49 }
 0x223   : > { %v4089_v2 = vld.sshfl [vmem:[#allocation1] sm:$0xff pattern:$0x73625140] }
 0x224   : > { %1551 = vst [vmem:[#allocation1] ss:$4 sm:$0xff] %v1413_v62  ;;  %v1452_v24 = vrot.slane %v1451_v33, 4  ;;  %v1486_v15 = vrot.slane %v1396_v57, 4 }
 0x225   : > { %1553 = vst [vmem:[#allocation1 + $0x1] ss:$4 sm:$0xff] %v1421_v52 }
 0x226   : > { %1555 = vst [vmem:[#allocation1 + $0x2] ss:$4 sm:$0xff] %v1429_v17  ;;  %v1291_v43 = vpop.permute.xlu0 %1290  ;;  %v1453_v55 = vsel %vm1118_vm8, 0.0, %v1452_v24 }
 0x227   : > { %1557 = vst [vmem:[#allocation1 + $0x3] ss:$4 sm:$0xff] %v1437_v16  ;;  %v1380_v62 = vmax.f32 %v3937_v28, %v1291_v43 }
 0x229   : > { %v1337_v59 = vpop.permute.xlu1 %1336  ;;  %v1293_v52 = vpop.permute.xlu2 %1292 }
 0x22a   : > { %v1403_v27 = vmax.f32 %v3948_v39, %v1337_v59 }
 0x22c   : > { %v1462_v36 = vrot.slane %v1403_v27, 4 }
 0x22e   : > { %v1558_v8 = vld.sshfl [vmem:[#allocation1] sm:$0xff pattern:$0x73625140]  ;;  %v1463_v21 = vsel %vm1118_vm8, %v1462_v36, %v1399_v29  ;;  %v1321_v1 = vpop.permute.xlu0 %1320 }
 0x22f   : > { %1566 = vst [vmem:[#allocation1] ss:$4 sm:$0xff] %v1443_v45  ;;  %v1467_v34 = vperm.slane %v1463_v21, %v3711_v35  ;;  %1559 = vrot.lane.b32.xlu1 %v1558_v8, %s3373_s15  ;;  %v1395_v39 = vmax.f32 %v3966_v9, %v1321_v1  ;;  %s3379_s15 = smov 118  }
 0x230   : > { %1568 = vst [vmem:[#allocation1 + $0x1] ss:$4 sm:$0xff] %v1451_v33 }
 0x231   : > { %1572 = vst [vmem:[#allocation1 + $0x3] ss:$4 sm:$0xff] %v1467_v34  ;;  %v1454_v22 = vrot.slane %v1395_v39, 4  ;;  %v1307_v7 = vpop.permute.xlu1 %1306  ;;  %v1468_v6 = vrot.slane %v1467_v34, 4  ;;  %v1341_v11 = vpop.permute.xlu2 %1340 }
 0x232   : > { %v1388_v9 = vmax.f32 %v3975_v5, %v1307_v7  ;;  %v1405_v7 = vmax.f32 %v4059_v14, %v1341_v11 }
 0x233   : > { %v1455_v41 = vsel %vm1118_vm8, %v1454_v22, %v1391_v23  ;;  %v1469_v5 = vsel %vm1118_vm8, 0.0, %v1468_v6  ;;  %v1381_v22 = vmax.f32 %v4032_v47, %v1293_v52 }
 0x234   : > { %v1459_v26 = vperm.slane %v1455_v41, %v3711_v35  ;;  %v1478_v46 = vrot.slane %v1388_v9, 4  ;;  %v1526_v24 = vrot.slane %v1405_v7, 4 }
 0x235   : > { %v1502_v14 = vrot.slane %v1381_v22, 4 }
 0x236   : > { %1570 = vst [vmem:[#allocation1 + $0x2] ss:$4 sm:$0xff] %v1459_v26  ;;  %v1315_v31 = vpop.permute.xlu0 %1314  ;;  %v1460_v50 = vrot.slane %v1459_v26, 4  ;;  %v1479_v28 = vsel %vm1118_vm8, %v1478_v46, %v1384_v13  ;;  %v3053_v13 = vld [vmem:[#allocation2 + $0x10] sm:$0xff] }
 0x237   : > { %v1392_v37 = vmax.f32 %v3978_v58, %v1315_v31  ;;  %v1483_v58 = vperm.slane %v1479_v28, %v3711_v35  ;;  %v3051_v28 = vld [vmem:[#allocation2] sm:$0xff] }
 0x238   : > { %v1461_v0 = vsel %vm1118_vm8, 0.0, %v1460_v50 }
 0x239   : > { %v1283_v48 = vpop.permute.xlu1 %1282  ;;  %v1487_v43 = vsel %vm1118_vm8, %v1486_v15, %v1392_v37  ;;  %v1484_v45 = vrot.slane %v1483_v58, 4  ;;  %v1317_v26 = vpop.permute.xlu2 %1316  ;;  %v3058_v15 = vld [vmem:[#allocation2 + $0x38] sm:$0xff] }
 0x23a   : > { %v1376_v16 = vmax.f32 %v3910_v60, %v1283_v48  ;;  %v1491_v4 = vperm.slane %v1487_v43, %v3711_v35  ;;  %v1393_v47 = vmax.f32 %v4035_v51, %v1317_v26  ;;  %1733 = vmatpush.bf16.msrb.mxu3 %v3058_v15  ;;  %v3057_v43 = vld [vmem:[#allocation2 + $0x30] sm:$0xff]  ;;  %v3080_v15 = vld [vmem:[#allocation5 + $0x48] sm:$0xff] }
 0x23b   : > { %v1485_v39 = vsel %vm1118_vm8, 0.0, %v1484_v45 }
 0x23c   : > { %v1492_v30 = vrot.slane %v1491_v4, 4 }
 0x23d   : > { %v1573_v44 = vld.sshfl [vmem:[#allocation1] sm:$0xff pattern:$0x73625140] }
 0x23e   : > { %1585 = vst [vmem:[#allocation1 + $0x2] ss:$4 sm:$0xff] %v1461_v0  ;;  %v1339_v54 = vpop.permute.xlu0 %1338  ;;  %1574 = vrot.lane.b32.xlu2 %v1573_v44, %s3367_s3  ;;  %v1493_v41 = vsel %vm1118_vm8, 0.0, %v1492_v30  ;;  %1734 = vmatpush.bf16.msrb.mxu3 %v3057_v43  ;;  %v3075_v43 = vld [vmem:[#allocation5 + $0x20] sm:$0xff] }
 0x23f   : > { %1581 = vst [vmem:[#allocation1] ss:$4 sm:$0xff] %v1445_v53  ;;  %v1404_v61 = vmax.f32 %v4021_v42, %v1339_v54  ;;  %v1470_v42 = vrot.slane %v1380_v62, 4 }
 0x240   : > { %1583 = vst [vmem:[#allocation1 + $0x1] ss:$4 sm:$0xff] %v1453_v55 }
 0x241   : > { %1587 = vst [vmem:[#allocation1 + $0x3] ss:$4 sm:$0xff] %v1469_v5  ;;  %v1494_v3 = vrot.slane %v1404_v61, 4  ;;  %v1331_v17 = vpop.permute.xlu1 %1330  ;;  %v1471_v32 = vsel %vm1118_vm8, %v1470_v42, %v1376_v16  ;;  %v3062_v16 = vld [vmem:[#allocation2 + $0x58] sm:$0xff]  ;;  %v3061_v42 = vld [vmem:[#allocation2 + $0x50] sm:$0xff] }
 0x242   : > { %v1400_v19 = vmax.f32 %v3987_v12, %v1331_v17  ;;  %v1475_v12 = vperm.slane %v1471_v32, %v3711_v35  ;;  %v3054_v17 = vld [vmem:[#allocation2 + $0x18] sm:$0xff]  ;;  %1823 = vmatpush.bf16.msrb.mxu1 %v3062_v16  ;;  %v3056_v32 = vld [vmem:[#allocation2 + $0x28] sm:$0xff]  ;;  %v3071_v16 = vld [vmem:[#allocation5] sm:$0xff] }
 0x243   : > { %1773 = vmatpush.bf16.msrb.mxu0 %v3054_v17  ;;  %1735 = vmatpush.bf16.msrb.mxu3 %v3056_v32  ;;  %v3078_v17 = vld [vmem:[#allocation5 + $0x38] sm:$0xff] }
 0x244   : > { %v1495_v25 = vsel %vm1118_vm8, %v1494_v3, %v1400_v19  ;;  %v1476_v36 = vrot.slane %v1475_v12, 4  ;;  %v3052_v19 = vld [vmem:[#allocation2 + $0x8] sm:$0xff] }
 0x245   : > { %v1499_v60 = vperm.slane %v1495_v25, %v3711_v35  ;;  %v3060_v25 = vld [vmem:[#allocation2 + $0x48] sm:$0xff] }
 0x246   : > { %v1309_v59 = vpop.permute.xlu0 %1308  ;;  %v1477_v21 = vsel %vm1118_vm8, 0.0, %v1476_v36  ;;  %1824 = vmatpush.bf16.msrb.mxu1 %v3061_v42  ;;  %v3076_v42 = vld [vmem:[#allocation5 + $0x28] sm:$0xff] }
 0x247   : > { %v1500_v8 = vrot.slane %v1499_v60, 4  ;;  %v1389_v23 = vmax.f32 %v4051_v10, %v1309_v59  ;;  %1774 = vmatpush.bf16.msrb.mxu0 %v3053_v13  ;;  %v3059_v59 = vld [vmem:[#allocation2 + $0x40] sm:$0xff]  ;;  %v3081_v13 = vld [vmem:[#allocation5 + $0x50] sm:$0xff] }
 0x248   : > { %v1588_v56 = vld.sshfl [vmem:[#allocation1] sm:$0xff pattern:$0x73625140] }
 0x249   : > { %1598 = vst [vmem:[#allocation1 + $0x1] ss:$4 sm:$0xff] %v1483_v58  ;;  %1589 = vrot.lane.b32.xlu0 %v1588_v56, %s3374_s16  ;;  %v1325_v27 = vpop.permute.xlu1 %1324  ;;  %v1510_v38 = vrot.slane %v1389_v23, 4  ;;  %v3055_v58 = vld [vmem:[#allocation2 + $0x20] sm:$0xff] }
 0x24a   : > { %1600 = vst [vmem:[#allocation1 + $0x2] ss:$4 sm:$0xff] %v1491_v4  ;;  %v1397_v33 = vmax.f32 %v4062_v18, %v1325_v27  ;;  %v1501_v18 = vsel %vm1118_vm8, 0.0, %v1500_v8  ;;  %1825 = vmatpush.bf16.msrb.mxu1 %v3060_v25  ;;  %1736 = vmatpush.bf16.msrb.mxu3 %v3055_v58  ;;  %v3070_v4 = vld [vmem:[%s4357_s5 + $0x38] sm:$0xff]  ;;  %v3193_v25 = vld [vmem:[%s4358_s6] ss:$0 sm:$0xff] }
 0x24b   : > { %1596 = vst [vmem:[#allocation1] ss:$4 sm:$0xff] %v1475_v12  ;;  %1775 = vmatpush.bf16.msrb.mxu0 %v3052_v19  ;;  %1908 = vmatpush.bf16.msra.mxu2 %v3070_v4  ;;  %v3077_v19 = vld [vmem:[#allocation5 + $0x30] sm:$0xff] }
 0x24c   : > { %1602 = vst [vmem:[#allocation1 + $0x3] ss:$4 sm:$0xff] %v1499_v60  ;;  %v1518_v31 = vrot.slane %v1397_v33, 4 }
 0x24e   : > { %v1285_v29 = vpop.permute.xlu0 %1284  ;;  %v1519_v6 = vsel %vm1118_vm8, %v1518_v31, %v1393_v47  ;;  %1826 = vmatpush.bf16.msrb.mxu1 %v3059_v59  ;;  %v3069_v47 = vld [vmem:[%s4357_s5 + $0x30] sm:$0xff]  ;;  %1989 = vmatpush.bf16.msra.mxu3 %v3078_v17 }
 0x24f   : > { %v1377_v10 = vmax.f32 %v4002_v20, %v1285_v29  ;;  %1776 = vmatpush.bf16.msrb.mxu0 %v3051_v28  ;;  %1909 = vmatpush.bf16.msra.mxu2 %v3069_v47  ;;  %v3079_v28 = vld [vmem:[#allocation5 + $0x40] sm:$0xff] }
 0x251   : > { %v1301_v34 = vpop.permute.xlu1 %1300  ;;  %v1503_v0 = vsel %vm1118_vm8, %v1502_v14, %v1377_v10  ;;  %v3067_v14 = vld [vmem:[%s4357_s5 + $0x20] sm:$0xff] }
 0x252   : > { %v1385_v49 = vmax.f32 %v4016_v40, %v1301_v34  ;;  %v1523_v40 = vperm.slane %v1519_v6, %v3711_v35  ;;  %v3065_v6 = vld [vmem:[%s4357_s5 + $0x10] sm:$0xff]  ;;  %1990 = vmatpush.bf16.msra.mxu3 %v3077_v19 }
 0x253   : > { %v1603_v1 = vld.sshfl [vmem:[#allocation1] sm:$0xff pattern:$0x73625140] }
 0x254   : > { %1611 = vst [vmem:[#allocation1] ss:$4 sm:$0xff] %v1477_v21  ;;  %1604 = vrot.lane.b32.xlu1 %v1603_v1, %s3368_s17  ;;  %v1511_v9 = vsel %vm1118_vm8, %v1510_v38, %v1385_v49  ;;  %v1524_v61 = vrot.slane %v1523_v40, 4  ;;  %v3068_v38 = vld [vmem:[%s4357_s5 + $0x28] sm:$0xff] }
 0x255   : > { %1613 = vst [vmem:[#allocation1 + $0x1] ss:$4 sm:$0xff] %v1485_v39  ;;  %v1515_v53 = vperm.slane %v1511_v9, %v3711_v35  ;;  %1910 = vmatpush.bf16.msra.mxu2 %v3068_v38  ;;  %v3064_v9 = vld [vmem:[%s4357_s5 + $0x8] sm:$0xff] }
 0x256   : > { %1615 = vst [vmem:[#allocation1 + $0x2] ss:$4 sm:$0xff] %v1493_v41  ;;  %v1333_v50 = vpop.permute.xlu0 %1332  ;;  %v1525_v37 = vsel %vm1118_vm8, 0.0, %v1524_v61  ;;  %1991 = vmatpush.bf16.msra.mxu3 %v3076_v42 }
 0x257   : > { %1617 = vst [vmem:[#allocation1 + $0x3] ss:$4 sm:$0xff] %v1501_v18  ;;  %v1401_v48 = vmax.f32 %v4046_v63, %v1333_v50  ;;  %v1507_v63 = vperm.slane %v1503_v0, %v3711_v35  ;;  %v1516_v57 = vrot.slane %v1515_v53, 4  ;;  %v3063_v0 = vld [vmem:[%s4357_s5] sm:$0xff] }
 0x259   : > { %v1527_v44 = vsel %vm1118_vm8, %v1526_v24, %v1401_v48  ;;  %v1508_v55 = vrot.slane %v1507_v63, 4  ;;  %v1517_v52 = vsel %vm1118_vm8, 0.0, %v1516_v57  ;;  %1911 = vmatpush.bf16.msra.mxu2 %v3067_v14  ;;  %v3066_v24 = vld [vmem:[%s4357_s5 + $0x18] sm:$0xff]  ;;  %v3192_v57 = vld [vmem:[%s4356_s4] ss:$0 sm:$0xff] }
 0x25a   : > { %v1531_v51 = vperm.slane %v1527_v44, %v3711_v35  ;;  %v3074_v44 = vld [vmem:[#allocation5 + $0x18] sm:$0xff]  ;;  %1992 = vmatpush.bf16.msra.mxu3 %v3075_v43 }
 0x25b   : > { %v1509_v46 = vsel %vm1118_vm8, 0.0, %v1508_v55  ;;  %2029 = vmatpush.bf16.msra.mxu0 %v3074_v44 }
 0x25c   : > { %v1532_v54 = vrot.slane %v1531_v51, 4 }
 0x25d   : > { %1912 = vmatpush.bf16.msra.mxu2 %v3066_v24 }
 0x25e   : > { %v1618_v20 = vld.sshfl [vmem:[#allocation1] sm:$0xff pattern:$0x73625140]  ;;  %v1533_v62 = vsel %vm1118_vm8, 0.0, %v1532_v54 }
 0x25f   : > { %1630 = vst [vmem:[#allocation1 + $0x2] ss:$4 sm:$0xff] %v1523_v40  ;;  %1619 = vrot.lane.b32.xlu2 %v1618_v20, %s3375_s21  ;;  %v3073_v40 = vld [vmem:[#allocation5 + $0x10] sm:$0xff] }
 0x260   : > { %1626 = vst [vmem:[#allocation1] ss:$4 sm:$0xff] %v1507_v63  ;;  %2030 = vmatpush.bf16.msra.mxu0 %v3073_v40 }
 0x261   : > { %1628 = vst [vmem:[#allocation1 + $0x1] ss:$4 sm:$0xff] %v1515_v53  ;;  %1913 = vmatpush.bf16.msra.mxu2 %v3065_v6 }
 0x262   : > { %1632 = vst [vmem:[#allocation1 + $0x3] ss:$4 sm:$0xff] %v1531_v51 }
 0x265   : > { %1914 = vmatpush.bf16.msra.mxu2 %v3064_v9 }
 0x269   : > { %v1633_v5 = vld.sshfl [vmem:[#allocation1] sm:$0xff pattern:$0x73625140]  ;;  %1915 = vmatpush.bf16.msra.mxu2 %v3063_v0 }
 0x26a   : > { %1647 = vst [vmem:[#allocation1 + $0x3] ss:$4 sm:$0xff] %v1533_v62  ;;  %1634 = vrot.lane.b32.xlu0 %v1633_v5, %s4371_s20  ;;  %s481_s20 = sand.u32 1, %s3349_s26  }
 0x26b   : > { %1641 = vst [vmem:[#allocation1] ss:$4 sm:$0xff] %v1509_v46  ;;  %s482_s24 = scalar_lea.vmem [#allocation8], %s481_s20 }
 0x26c   : > { %1643 = vst [vmem:[#allocation1 + $0x1] ss:$4 sm:$0xff] %v1517_v52  ;;  %s2640_s30 = sshll.u32 %s482_s24, 4  ;;  %s2641_s30 = int_to_ptr.vmem [resolvable:$true] %s2640_s30 }
 0x26d   : > { %1645 = vst [vmem:[#allocation1 + $0x2] ss:$4 sm:$0xff] %v1525_v37  ;;  %v3082_v37 = vld [vmem:[#allocation5 + $0x58] sm:$0xff] }
 0x26e   : > { %2079 = vmatpush.bf16.msra.mxu1 %v3082_v37 }
 0x272   : > { %2080 = vmatpush.bf16.msra.mxu1 %v3081_v13 }
 0x274   : > { %v1648_v3 = vld.sshfl [vmem:[#allocation1] sm:$0xff pattern:$0x73625140] }
 0x275   : > { %1649 = vrot.lane.b32.xlu1 %v1648_v3, %s3376_s22  ;;  %v3072_v3 = vld [vmem:[#allocation5 + $0x8] sm:$0xff]  ;;  %s2638_s22 = scalar_lea.hbm %s4365_s13, %s3471_s29 }
 0x276   : > { %2031 = vmatpush.bf16.msra.mxu0 %v3072_v3  ;;  %2081 = vmatpush.bf16.msra.mxu1 %v3080_v15 }
 0x27a   : > { %2032 = vmatpush.bf16.msra.mxu0 %v3071_v16  ;;  %2082 = vmatpush.bf16.msra.mxu1 %v3079_v28 }
 0x298   : > { %v1575_v12 = vpop.permute.xlu2 %1574 }
 0x2a1   : > { %v1560_v56 = vpop.permute.xlu1 %1559 }
 0x2a2   : > { %v1653_v27 = vsel %vm1652_vm9, %v4089_v2, %v1560_v56 }
 0x2a3   : > { %v1655_v29 = vsel %vm1654_vm10, %v1653_v27, %v1575_v12 }
 0x2b9   : > { %v1620_v8 = vpop.permute.xlu2 %1619 }
 0x2bb   : > { %v1590_v60 = vpop.permute.xlu0 %1589 }
 0x2bc   : > { %v1657_v36 = vsel %vm1656_vm11, %v1655_v29, %v1590_v60 }
 0x2c6   : > { %v1605_v11 = vpop.permute.xlu1 %1604 }
 0x2c7   : > { %v1659_v45 = vsel %vm1658_vm12, %v1657_v36, %v1605_v11 }
 0x2c8   : > { %v1661_v33 = vsel %vm1660_vm13, %v1659_v45, %v1620_v8 }
 0x2dc   : > { %v1635_v30 = vpop.permute.xlu0 %1634 }
 0x2dd   : > { %v1663_v21 = vsel %vm1662_vm14, %v1661_v33, %v1635_v30 }
 0x2e7   : > { %v1650_v1 = vpop.permute.xlu1 %1649 }
 0x2e8   : > { %v1665_v34 = vsel %vm1664_vm15, %v1663_v21, %v1650_v1 }
 0x2e9   : > { %v1667_v2 = vrot.slane %v1665_v34, 7 }
 0x2eb   : > { %v1669_v39 = vsel %vm493_vm0, 0.0, %v1667_v2  ;;  %v1670_v23 = vsel %vm493_vm0, %v1667_v2, 0.0 }
 0x2ec   : > { %v1671_v22 = vpack.c.bf16 %v1669_v39, %v1669_v39  ;;  %v1672_v7 = vpack.c.bf16 %v1670_v23, %v1670_v23 }
 0x2ee   : > { %v1692_v41 = vunpack.c.l.b16 %v1671_v22  ;;  %v1693_v26 = vunpack.c.l.b16 %v1672_v7  ;;  %2848 = vmatmul.msk.bf16.vlgmr.msrb.gmra.mxu0 %vm567_vm1, %v1671_v22 }
 0x2f0   : > { %v1694_v18 = vpack.c.b16 %v1693_v26, %v1692_v41  ;;  %v3194_v41 = vld [vmem:[%s4360_s8] ss:$0 sm:$0xff] }
 0x2f2   : > { %v1791_v31 = vrot.slane %v1694_v18, 1  ;;  %v1698_v49 = vshll.u32 %v1694_v18, 16  ;;  %v1696_v50 = vshrl.u32 %v1694_v18, 16 }
 0x2f4   : > { %2865 = vmatmul.msk.bf16.vlgmr.msrb.gmra.mxu1 %vm567_vm1, %v1791_v31  ;;  %v1700_v10 = vrot.slane %v1698_v49, 1 }
 0x2f6   : > { %v1701_v48 = vor.u32 %v1700_v10, %v1696_v50 }
 0x2f8   : > { %2831 = vmatmul.msk.bf16.vlgmr.msrb.gmra.mxu3 %vm567_vm1, %v1701_v48 }
 0x36b   : > { %v1778_v53 = vpop.f32.mrf.mxu0 }
 0x371   : > { %v1828_v20 = vpop.f32.mrf.mxu1 }
 0x373   : > { %v1780_v63 = vpop.f32.mrf.mxu0 }
 0x379   : > { %v1830_v51 = vpop.f32.mrf.mxu1 }
 0x37b   : > { %v1738_v54 = vpop.f32.mrf.mxu3 }
 0x37c   : > { %v1779_v55 = vadd.f32 %v1778_v53, %v1738_v54 }
 0x37e   : > { %v1832_v61 = vadd.f32 %v1828_v20, %v1779_v55 }
 0x380   : > { %v1837_v62 = vadd.f32 %v3192_v57, %v1832_v61 }
 0x382   : > { %v1838_v5 = vmax.f32 %v1837_v62, 0.0 }
 0x383   : > { %v1740_v46 = vpop.f32.mrf.mxu3 }
 0x384   : > { %v1839_v52 = vpack.c.bf16 %v1838_v5, %v1838_v5 }
 0x386   : > { %1916 = vmatmul.bf16.vlgmr.msra.gmra.mxu2 %v1839_v52 }
 0x409   : > { %v1917_v32 = vpop.f32.mrf.mxu2 }
 0x40a   : > { %v1918_v59 = vadd.f32 %v3193_v25, %v1917_v32 }
 0x40c   : > { %v1921_v58 = vmax.f32 %v1918_v59, 0.0 }
 0x40e   : > { %v1923_v56 = vrot.slane %v1921_v58, 7 }
 0x410   : > { %v1925_v4 = vsel %vm493_vm0, 0.0, %v1923_v56  ;;  %v1926_v60 = vsel %vm493_vm0, %v1923_v56, 0.0 }
 0x411   : > { %v1927_v12 = vpack.c.bf16 %v1925_v4, %v1925_v4  ;;  %v1928_v27 = vpack.c.bf16 %v1926_v60, %v1926_v60  ;;  %v1919_v11 = vpop.f32.mrf.mxu2 }
 0x413   : > { %v1948_v29 = vunpack.c.l.b16 %v1927_v12  ;;  %v1949_v36 = vunpack.c.l.b16 %v1928_v27  ;;  %2931 = vmatmul.msk.bf16.vlgmr.msra.gmra.mxu0 %vm567_vm1, %v1927_v12 }
 0x415   : > { %v1950_v45 = vpack.c.b16 %v1949_v36, %v1948_v29 }
 0x417   : > { %v1954_v30 = vshll.u32 %v1950_v45, 16  ;;  %v2047_v8 = vrot.slane %v1950_v45, 1  ;;  %v1952_v33 = vshrl.u32 %v1950_v45, 16 }
 0x419   : > { %v1956_v21 = vrot.slane %v1954_v30, 1  ;;  %2948 = vmatmul.msk.bf16.vlgmr.msra.gmra.mxu1 %vm567_vm1, %v2047_v8 }
 0x41b   : > { %v1957_v1 = vor.u32 %v1956_v21, %v1952_v33 }
 0x41d   : > { %2914 = vmatmul.msk.bf16.vlgmr.msra.gmra.mxu3 %vm567_vm1, %v1957_v1 }
 0x490   : > { %v2034_v34 = vpop.f32.mrf.mxu0 }
 0x496   : > { %v2084_v2 = vpop.f32.mrf.mxu1 }
 0x498   : > { %v2036_v39 = vpop.f32.mrf.mxu0 }
 0x49e   : > { %v2086_v23 = vpop.f32.mrf.mxu1 }
 0x4a0   : > { %v1994_v22 = vpop.f32.mrf.mxu3 }
 0x4a1   : > { %v2035_v7 = vadd.f32 %v2034_v34, %v1994_v22 }
 0x4a3   : > { %v2088_v26 = vadd.f32 %v2084_v2, %v2035_v7 }
 0x4a5   : > { %v2093_v18 = vadd.f32 %v3194_v41, %v2088_v26 }
 0x4a7   : > { %v2094_v31 = vmax.f32 %v2093_v18, 0.0 }
 0x4a8   : > { %v1996_v49 = vpop.f32.mrf.mxu3 }
 0x4a9   : > { %v2949_v50 = vrot.slane %v2094_v31, 9  ;;  %v2098_v10 = vrot.slane %v2094_v31, 6  ;;  %v2096_v48 = vrot.slane %v2094_v31, 2  ;;  %v2097_v47 = vrot.slane %v2094_v31, 4 }
 0x4ab   : > { %v2114_v38 = vmax.f32 %v2094_v31, %v2949_v50  ;;  %v2952_v14 = vrot.slane %v2098_v10, 9  ;;  %v2950_v24 = vrot.slane %v2096_v48, 9  ;;  %v2951_v6 = vrot.slane %v2097_v47, 9 }
 0x4ad   : > { %2122 = vrot.lane.b32.xlu1 %v2114_v38, %s3369_s19  ;;  %v2117_v9 = vmax.f32 %v2098_v10, %v2952_v14  ;;  %v2115_v0 = vmax.f32 %v2096_v48, %v2950_v24  ;;  %v2116_v40 = vmax.f32 %v2097_v47, %v2951_v6 }
 0x4af   : > { %2128 = vrot.lane.b32.xlu0 %v2117_v9, %s3369_s19  ;;  %v2155_v44 = vrot.slane %v2117_v9, 7  ;;  %2124 = vrot.lane.b32.xlu2 %v2115_v0, %s3369_s19  ;;  %v2148_v53 = vrot.slane %v2115_v0, 7 }
 0x4b1   : > { %v2156_v20 = vsel %vm860_vm4, %v2155_v44, %v2116_v40  ;;  %v2149_v63 = vsel %vm860_vm4, %v2148_v53, %v2114_v38 }
 0x4b2   : > { %v2150_v51 = vsel %vm862_vm5, %v2148_v53, %v2149_v63  ;;  %v2157_v54 = vsel %vm862_vm5, %v2155_v44, %v2156_v20 }
 0x4b3   : > { %v2151_v55 = vsel %vm864_vm6, %v2148_v53, %v2150_v51  ;;  %v2158_v57 = vsel %vm864_vm6, %v2155_v44, %v2157_v54 }
 0x4b4   : > { %v2152_v61 = vsel %vm866_vm7, %v2148_v53, %v2151_v55  ;;  %v2159_v62 = vsel %vm866_vm7, %v2155_v44, %v2158_v57 }
 0x4b5   : > { %2138 = vrot.lane.b32.xlu1 %v2114_v38, %s3368_s17 }
 0x4b7   : > { %2140 = vrot.lane.b32.xlu0 %v2115_v0, %s3368_s17  ;;  %2126 = vrot.lane.b32.xlu2 %v2116_v40, %s3369_s19 }
 0x4bd   : > { %2144 = vrot.lane.b32.xlu1 %v2117_v9, %s3368_s17 }
 0x4bf   : > { %2136 = vrot.lane.b32.xlu0 %v2117_v9, %s3364_s25  ;;  %2132 = vrot.lane.b32.xlu2 %v2115_v0, %s3364_s25 }
 0x4c5   : > { %2134 = vrot.lane.b32.xlu1 %v2116_v40, %s3364_s25 }
 0x4c7   : > { %2130 = vrot.lane.b32.xlu0 %v2114_v38, %s3364_s25  ;;  %2142 = vrot.lane.b32.xlu2 %v2116_v40, %s3368_s17  ;;  %s4385_s25 = smov 48  }
 0x509   : > { %v2125_v5 = vpop.permute.xlu2 %2124 }
 0x50a   : > { %v2162_v52 = vrot.slane %v2125_v5, 7 }
 0x511   : > { %v2127_v46 = vpop.permute.xlu2 %2126 }
 0x519   : > { %v2133_v59 = vpop.permute.xlu2 %2132 }
 0x51a   : > { %v2176_v49 = vrot.slane %v2133_v59, 7 }
 0x51f   : > { %v2123_v37 = vpop.permute.xlu1 %2122 }
 0x520   : > { %v2163_v3 = vsel %vm860_vm4, %v2162_v52, %v2123_v37 }
 0x521   : > { %v2164_v17 = vsel %vm862_vm5, %v2162_v52, %v2163_v3  ;;  %v2129_v13 = vpop.permute.xlu0 %2128  ;;  %v2143_v34 = vpop.permute.xlu2 %2142 }
 0x522   : > { %v2165_v16 = vsel %vm864_vm6, %v2162_v52, %v2164_v17  ;;  %v2169_v19 = vrot.slane %v2129_v13, 7 }
 0x523   : > { %v2166_v15 = vsel %vm866_vm7, %v2162_v52, %v2165_v16 }
 0x524   : > { %v2210_v42 = vrot.slane %v2166_v15, 4  ;;  %v2170_v28 = vsel %vm860_vm4, %v2169_v19, %v2127_v46 }
 0x525   : > { %v2171_v43 = vsel %vm862_vm5, %v2169_v19, %v2170_v28 }
 0x526   : > { %v2172_v25 = vsel %vm864_vm6, %v2169_v19, %v2171_v43  ;;  %v2211_v32 = vsel %vm1118_vm8, %v2210_v42, %v2152_v61 }
 0x527   : > { %v2173_v58 = vsel %vm866_vm7, %v2169_v19, %v2172_v25  ;;  %v2139_v56 = vpop.permute.xlu1 %2138  ;;  %v2215_v4 = vperm.slane %v2211_v32, %v3711_v35 }
 0x528   : > { %v2226_v60 = vrot.slane %v2173_v58, 4 }
 0x529   : > { %v2141_v12 = vpop.permute.xlu0 %2140  ;;  %2250 = vrot.lane.b32.xlu1 %v2215_v4, %s3366_s14  ;;  %v2216_v27 = vrot.slane %v2215_v4, 4 }
 0x52a   : > { %v2227_v11 = vsel %vm1118_vm8, %v2226_v60, %v2159_v62  ;;  %v2190_v45 = vrot.slane %v2141_v12, 7 }
 0x52b   : > { %v2217_v29 = vsel %vm1118_vm8, 0.0, %v2216_v27  ;;  %v2231_v36 = vperm.slane %v2227_v11, %v3711_v35 }
 0x52c   : > { %2254 = vrot.lane.b32.xlu2 %v2217_v29, %s3366_s14  ;;  %v2191_v21 = vsel %vm860_vm4, %v2190_v45, %v2139_v56 }
 0x52d   : > { %v2232_v30 = vrot.slane %v2231_v36, 4  ;;  %v2192_v23 = vsel %vm862_vm5, %v2190_v45, %v2191_v21 }
 0x52e   : > { %v2193_v41 = vsel %vm864_vm6, %v2190_v45, %v2192_v23 }
 0x52f   : > { %v2145_v8 = vpop.permute.xlu1 %2144  ;;  %v2233_v33 = vsel %vm1118_vm8, 0.0, %v2232_v30  ;;  %v2194_v10 = vsel %vm866_vm7, %v2190_v45, %v2193_v41 }
 0x530   : > { %v2197_v1 = vrot.slane %v2145_v8, 7  ;;  %2262 = vrot.lane.b32.xlu0 %v2233_v33, %s3366_s14  ;;  %v2218_v0 = vrot.slane %v2194_v10, 4  ;;  %v3093_v10 = vld [vmem:[#allocation7 + $0x50] sm:$0xff] }
 0x531   : > { %v2137_v2 = vpop.permute.xlu0 %2136 }
 0x532   : > { %v2198_v39 = vsel %vm860_vm4, %v2197_v1, %v2143_v34  ;;  %v2183_v26 = vrot.slane %v2137_v2, 7 }
 0x533   : > { %v2199_v22 = vsel %vm862_vm5, %v2197_v1, %v2198_v39 }
 0x534   : > { %v2200_v7 = vsel %vm864_vm6, %v2197_v1, %v2199_v22  ;;  %2258 = vrot.lane.b32.xlu2 %v2231_v36, %s3366_s14 }
 0x535   : > { %v2201_v18 = vsel %vm866_vm7, %v2197_v1, %v2200_v7 }
 0x536   : > { %v2234_v38 = vrot.slane %v2201_v18, 4  ;;  %v3086_v18 = vld [vmem:[#allocation7 + $0x18] sm:$0xff] }
 0x537   : > { %v2135_v31 = vpop.permute.xlu1 %2134  ;;  %2456 = vmatpush.bf16.msrb.mxu0 %v3086_v18 }
 0x538   : > { %v2184_v50 = vsel %vm860_vm4, %v2183_v26, %v2135_v31  ;;  %v3094_v31 = vld [vmem:[#allocation7 + $0x58] sm:$0xff] }
 0x539   : > { %v2185_v48 = vsel %vm862_vm5, %v2183_v26, %v2184_v50  ;;  %v2131_v47 = vpop.permute.xlu0 %2130  ;;  %2506 = vmatpush.bf16.msrb.mxu1 %v3094_v31  ;;  %v3090_v50 = vld [vmem:[#allocation7 + $0x38] sm:$0xff] }
 0x53a   : > { %v2186_v14 = vsel %vm864_vm6, %v2183_v26, %v2185_v48  ;;  %v2177_v24 = vsel %vm860_vm4, %v2176_v49, %v2131_v47  ;;  %2416 = vmatpush.bf16.msrb.mxu3 %v3090_v50  ;;  %v3083_v48 = vld [vmem:[#allocation7] sm:$0xff]  ;;  %v3089_v47 = vld [vmem:[#allocation7 + $0x30] sm:$0xff] }
 0x53b   : > { %v2187_v6 = vsel %vm866_vm7, %v2183_v26, %v2186_v14  ;;  %v2178_v9 = vsel %vm862_vm5, %v2176_v49, %v2177_v24  ;;  %v3088_v14 = vld [vmem:[#allocation7 + $0x28] sm:$0xff]  ;;  %v3091_v24 = vld [vmem:[#allocation7 + $0x40] sm:$0xff] }
 0x53c   : > { %v2179_v44 = vsel %vm864_vm6, %v2176_v49, %v2178_v9  ;;  %v2235_v40 = vsel %vm1118_vm8, %v2234_v38, %v2187_v6  ;;  %v3092_v38 = vld [vmem:[#allocation7 + $0x48] sm:$0xff]  ;;  %v3087_v6 = vld [vmem:[#allocation7 + $0x20] sm:$0xff]  ;;  %v3102_v9 = vld [vmem:[%s4363_s11 + $0x38] sm:$0xff] }
 0x53d   : > { %v2180_v53 = vsel %vm866_vm7, %v2176_v49, %v2179_v44  ;;  %v2239_v20 = vperm.slane %v2235_v40, %v3711_v35  ;;  %v3085_v49 = vld [vmem:[#allocation7 + $0x10] sm:$0xff]  ;;  %2507 = vmatpush.bf16.msrb.mxu1 %v3093_v10  ;;  %2591 = vmatpush.bf16.msrb.mxu2 %v3102_v9 }
 0x53e   : > { %v2219_v63 = vsel %vm1118_vm8, %v2218_v0, %v2180_v53  ;;  %2457 = vmatpush.bf16.msrb.mxu0 %v3085_v49  ;;  %2417 = vmatpush.bf16.msrb.mxu3 %v3089_v47 }
 0x53f   : > { %v2223_v51 = vperm.slane %v2219_v63, %v3711_v35  ;;  %v2240_v54 = vrot.slane %v2239_v20, 4 }
 0x541   : > { %2252 = vrot.lane.b32.xlu2 %v2223_v51, %s3366_s14  ;;  %v2241_v55 = vsel %vm1118_vm8, 0.0, %v2240_v54  ;;  %v2224_v57 = vrot.slane %v2223_v51, 4  ;;  %2508 = vmatpush.bf16.msrb.mxu1 %v3092_v38 }
 0x542   : > { %2264 = vrot.lane.b32.xlu1 %v2241_v55, %s3366_s14  ;;  %2418 = vmatpush.bf16.msrb.mxu3 %v3088_v14 }
 0x543   : > { %v2225_v61 = vsel %vm1118_vm8, 0.0, %v2224_v57 }
 0x544   : > { %2256 = vrot.lane.b32.xlu0 %v2225_v61, %s3366_s14 }
 0x545   : > { %2509 = vmatpush.bf16.msrb.mxu1 %v3091_v24 }
 0x546   : > { %2419 = vmatpush.bf16.msrb.mxu3 %v3087_v6 }
 0x54c   : > { %2260 = vrot.lane.b32.xlu0 %v2239_v20, %s3366_s14  ;;  %s2630_s14 = scalar_lea.sflag [#allocation4], %s481_s20 }
 0x586   : > { %v2255_v62 = vpop.permute.xlu2 %2254 }
 0x587   : > { %v2276_v5 = vmax.f32 %v2217_v29, %v2255_v62 }
 0x589   : > { %v2282_v52 = vrot.slane %v2276_v5, 4 }
 0x58e   : > { %v2259_v13 = vpop.permute.xlu2 %2258 }
 0x58f   : > { %v2278_v15 = vmax.f32 %v2231_v36, %v2259_v13  ;;  %v3100_v13 = vld [vmem:[%s4363_s11 + $0x28] sm:$0xff] }
 0x59b   : > { %v2251_v46 = vpop.permute.xlu1 %2250 }
 0x59c   : > { %v2274_v37 = vmax.f32 %v2215_v4, %v2251_v46  ;;  %v2253_v4 = vpop.permute.xlu2 %2252 }
 0x59d   : > { %v2275_v11 = vmax.f32 %v2223_v51, %v2253_v4  ;;  %v3195_v4 = vld [vmem:[%s4362_s10] ss:$0 sm:$0xff] }
 0x59e   : > { %v2283_v3 = vsel %vm1118_vm8, %v2282_v52, %v2274_v37 }
 0x59f   : > { %v2287_v17 = vperm.slane %v2283_v3, %v3711_v35 }
 0x5a1   : > { %2316 = vst [vmem:[#allocation1] ss:$4 sm:$0xff] %v2287_v17  ;;  %v2288_v25 = vrot.slane %v2287_v17, 4  ;;  %v3101_v17 = vld [vmem:[%s4363_s11 + $0x30] sm:$0xff] }
 0x5a2   : > { %v2263_v16 = vpop.permute.xlu0 %2262  ;;  %2592 = vmatpush.bf16.msrb.mxu2 %v3101_v17 }
 0x5a3   : > { %v2280_v19 = vmax.f32 %v2233_v33, %v2263_v16  ;;  %v2289_v59 = vsel %vm1118_vm8, 0.0, %v2288_v25  ;;  %v3099_v16 = vld [vmem:[%s4363_s11 + $0x20] sm:$0xff] }
 0x5a5   : > { %v2290_v42 = vrot.slane %v2280_v19, 4  ;;  %v3098_v19 = vld [vmem:[%s4363_s11 + $0x18] sm:$0xff] }
 0x5a6   : > { %2593 = vmatpush.bf16.msrb.mxu2 %v3100_v13 }
 0x5a7   : > { %v2291_v28 = vsel %vm1118_vm8, %v2290_v42, %v2278_v15  ;;  %v3097_v15 = vld [vmem:[%s4363_s11 + $0x10] sm:$0xff]  ;;  %v3096_v42 = vld [vmem:[%s4363_s11 + $0x8] sm:$0xff] }
 0x5a8   : > { %v2295_v43 = vperm.slane %v2291_v28, %v3711_v35  ;;  %v3095_v28 = vld [vmem:[%s4363_s11] sm:$0xff] }
 0x5aa   : > { %2318 = vst [vmem:[#allocation1 + $0x1] ss:$4 sm:$0xff] %v2295_v43  ;;  %v2296_v32 = vrot.slane %v2295_v43, 4  ;;  %2594 = vmatpush.bf16.msrb.mxu2 %v3099_v16 }
 0x5ac   : > { %v2297_v56 = vsel %vm1118_vm8, 0.0, %v2296_v32 }
 0x5ae   : > { %2595 = vmatpush.bf16.msrb.mxu2 %v3098_v19 }
 0x5b1   : > { %v2319_v58 = vld.sshfl [vmem:[#allocation1] sm:$0xff pattern:$0x73625140] }
 0x5b2   : > { %2323 = vst [vmem:[#allocation1] ss:$4 sm:$0xff] %v2289_v59  ;;  %2596 = vmatpush.bf16.msrb.mxu2 %v3097_v15 }
 0x5b3   : > { %2325 = vst [vmem:[#allocation1 + $0x1] ss:$4 sm:$0xff] %v2297_v56 }
 0x5b4   : > { %v2265_v27 = vpop.permute.xlu1 %2264 }
 0x5b5   : > { %v2281_v45 = vmax.f32 %v2241_v55, %v2265_v27 }
 0x5b6   : > { %v2257_v60 = vpop.permute.xlu0 %2256  ;;  %2597 = vmatpush.bf16.msrb.mxu2 %v3096_v42 }
 0x5b7   : > { %v2277_v12 = vmax.f32 %v2225_v61, %v2257_v60  ;;  %v2306_v21 = vrot.slane %v2281_v45, 4 }
 0x5b9   : > { %v2298_v29 = vrot.slane %v2277_v12, 4 }
 0x5ba   : > { %v2326_v36 = vld.sshfl [vmem:[#allocation1] sm:$0xff pattern:$0x73625140]  ;;  %2598 = vmatpush.bf16.msrb.mxu2 %v3095_v28 }
 0x5bb   : > { %v2299_v30 = vsel %vm1118_vm8, %v2298_v29, %v2275_v11  ;;  %2327 = vrot.lane.b32.xlu1 %v2326_v36, %s3367_s3  ;;  %v3196_v36 = vld [vmem:[%s4364_s12] ss:$0 sm:$0xff] }
 0x5bc   : > { %v2303_v8 = vperm.slane %v2299_v30, %v3711_v35 }
 0x5be   : > { %2332 = vst [vmem:[#allocation1] ss:$4 sm:$0xff] %v2303_v8  ;;  %v2261_v33 = vpop.permute.xlu0 %2260  ;;  %v2304_v39 = vrot.slane %v2303_v8, 4 }
 0x5bf   : > { %v2279_v1 = vmax.f32 %v2239_v20, %v2261_v33 }
 0x5c0   : > { %v2305_v22 = vsel %vm1118_vm8, 0.0, %v2304_v39 }
 0x5c1   : > { %v2307_v34 = vsel %vm1118_vm8, %v2306_v21, %v2279_v1 }
 0x5c2   : > { %v2311_v2 = vperm.slane %v2307_v34, %v3711_v35  ;;  %v3084_v35 = vld [vmem:[#allocation7 + $0x8] sm:$0xff] }
 0x5c3   : > { %2458 = vmatpush.bf16.msrb.mxu0 %v3084_v35 }
 0x5c4   : > { %2334 = vst [vmem:[#allocation1 + $0x1] ss:$4 sm:$0xff] %v2311_v2  ;;  %v2312_v23 = vrot.slane %v2311_v2, 4 }
 0x5c6   : > { %v2313_v41 = vsel %vm1118_vm8, 0.0, %v2312_v23 }
 0x5c7   : > { %2459 = vmatpush.bf16.msrb.mxu0 %v3083_v48 }
 0x5cb   : > { %v2335_v7 = vld.sshfl [vmem:[#allocation1] sm:$0xff pattern:$0x73625140] }
 0x5cc   : > { %2336 = vrot.lane.b32.xlu2 %v2335_v7, %s3368_s17  ;;  %2341 = vst [vmem:[#allocation1] ss:$4 sm:$0xff] %v2305_v22 }
 0x5cd   : > { %2343 = vst [vmem:[#allocation1 + $0x1] ss:$4 sm:$0xff] %v2313_v41 }
 0x5d4   : > { %v2344_v26 = vld.sshfl [vmem:[#allocation1] sm:$0xff pattern:$0x73625140] }
 0x5d5   : > { %2345 = vrot.lane.b32.xlu0 %v2344_v26, %s4385_s25  ;;  %s2642_s25 = sshll.u32 %s2638_s22, 4  ;;  %s2643_s25 = int_to_ptr.hbm [resolvable:$true] %s2642_s25 }
 0x5d6   : > { %s3301_s3 = sshra.s32 %s2643_s25, 4  ;;  %s3302_s3 = int_to_ptr.hbm [resolvable:$true] %s3301_s3 }
 0x5d7   : > { %s3303_s17 = scalar_lea.hbm %s3302_s3, 1  ;;  %p3308_p3 = scmp.lt.s32.totalorder %s3302_s3, %s4365_s13 }
 0x5d8   : > { %p3304_p0 = scmp.ne.s32.totalorder %s3302_s3, %s3303_s17  ;;  %p3309_p4 = scmp.lt.s32.totalorder %s3307_s7, %s3303_s17 }
 0x5da   : > { %p3305_p1 = pnand %p3304_p0, %p3488_p5  ;;  %p3310_p7 = por %p3309_p4, %p3308_p3 }
 0x5dc   : > { %p3306_p2 = pneg %p3305_p1 }
 0x5de   : > { %p3311_p8 = pnand %p3310_p7, %p3306_p2 }
 0x626   : > { %v2337_v40 = vpop.permute.xlu2 %2336 }
 0x62d   : > { %v2328_v0 = vpop.permute.xlu1 %2327 }
 0x62e   : > { %v2348_v44 = vsel %vm1654_vm10, %v2319_v58, %v2328_v0 }
 0x62f   : > { %v2349_v53 = vsel %vm1658_vm12, %v2348_v44, %v2337_v40 }
 0x647   : > { %v2346_v20 = vpop.permute.xlu0 %2345 }
 0x648   : > { %v2350_v63 = vsel %vm1662_vm14, %v2349_v53, %v2346_v20 }
 0x649   : > { %v2352_v51 = vrot.slane %v2350_v63, 7 }
 0x64b   : > { %v2354_v54 = vsel %vm493_vm0, 0.0, %v2352_v51  ;;  %vm2605_vm0 = vcmask 322560  }
 0x64c   : > { %v2356_v55 = vsel %vm2355_vm2, %v2354_v54, 0.0 }
 0x64d   : > { %v2357_v57 = vpack.c.bf16 %v2356_v55, %v2356_v55 }
 0x64f   : > { %v2376_v61 = vunpack.c.l.b16 %v2357_v57  ;;  %2986 = vmatmul.msk.bf16.vlgmr.msrb.gmra.mxu0 %vm567_vm1, %v2357_v57 }
 0x651   : > { %v2377_v62 = vpack.c.b16 %v2376_v61, %v2376_v61 }
 0x653   : > { %v2381_v5 = vshll.u32 %v2377_v62, 16  ;;  %v2474_v46 = vrot.slane %v2377_v62, 1  ;;  %v2379_v52 = vshrl.u32 %v2377_v62, 16 }
 0x655   : > { %v2383_v37 = vrot.slane %v2381_v5, 1  ;;  %3003 = vmatmul.msk.bf16.vlgmr.msrb.gmra.mxu1 %vm567_vm1, %v2474_v46 }
 0x657   : > { %v2384_v3 = vor.u32 %v2383_v37, %v2379_v52 }
 0x659   : > { %2969 = vmatmul.msk.bf16.vlgmr.msrb.gmra.mxu3 %vm567_vm1, %v2384_v3  ;;  %vm2627_vm1 = vcmask 73728  }
 0x6cc   : > { %v2461_v43 = vpop.f32.mrf.mxu0 }
 0x6d2   : > { %v2511_v25 = vpop.f32.mrf.mxu1 }
 0x6d4   : > { %v2463_v32 = vpop.f32.mrf.mxu0 }
 0x6da   : > { %v2513_v59 = vpop.f32.mrf.mxu1 }
 0x6dc   : > { %v2421_v58 = vpop.f32.mrf.mxu3 }
 0x6dd   : > { %v2462_v56 = vadd.f32 %v2461_v43, %v2421_v58 }
 0x6df   : > { %v2515_v60 = vadd.f32 %v2511_v25, %v2462_v56 }
 0x6e1   : > { %v2520_v12 = vadd.f32 %v3195_v4, %v2515_v60 }
 0x6e3   : > { %v2521_v27 = vmax.f32 %v2520_v12, 0.0 }
 0x6e4   : > { %v2423_v11 = vpop.f32.mrf.mxu3 }
 0x6e5   : > { %v2522_v29 = vpack.c.bf16 %v2521_v27, %v2521_v27 }
 0x6e7   : > { %2599 = vmatmul.bf16.vlgmr.msrb.gmra.mxu2 %v2522_v29 }
 0x76a   : > { %v2600_v45 = vpop.f32.mrf.mxu2 }
 0x76b   : > { %v2601_v30 = vadd.f32 %v3196_v36, %v2600_v45 }
 0x76d   : > { %v2604_v8 = vmax.f32 %v2601_v30, 0.0 }
 0x76f   : > { %v2606_v33 = vsel %vm2605_vm0, %v2604_v8, 0.0 }
 0x770   : > { %v2607_v21 = vrot.slane %v2606_v33, 4 }
 0x772   : > { %v2608_v1 = vadd.f32 %v2607_v21, %v2606_v33  ;;  %v2602_v34 = vpop.f32.mrf.mxu2 }
 0x774   : > { %v2609_v2 = vrot.slane %v2608_v1, 2 }
 0x776   : > { %v2610_v39 = vadd.f32 %v2609_v2, %v2608_v1 }
 0x778   : > { %v2611_v23 = vrot.slane %v2610_v39, 1 }
 0x77a   : > { %v2612_v22 = vadd.f32 %v2611_v23, %v2610_v39 }
 0x77c   : > { %2622 = vrot.lane.b32.xlu0 %v2612_v22, %s3377_s27  ;;  %2618 = vrot.lane.b32.xlu2 %v2612_v22, %s3378_s23 }
 0x77d   : > { %2614 = vrot.lane.b32.xlu1 %v2612_v22, %s3379_s15 }
 0x7d6   : > { %v2619_v26 = vpop.permute.xlu2 %2618 }
 0x7ee   : > { %v2623_v31 = vpop.permute.xlu0 %2622 }
 0x7ef   : > { %v2615_v7 = vpop.permute.xlu1 %2614 }
 0x7f0   : > { %v2617_v41 = vadd.f32 %v2615_v7, %v2612_v22 }
 0x7f2   : > { %v2621_v18 = vadd.f32 %v2619_v26, %v2617_v41 }
 0x7f4   : > { %v2625_v49 = vadd.f32 %v2623_v31, %v2621_v18 }
 0x7f6   : > { %v2626_v35 = vmul.f32 0.0625, %v2625_v49 }
 0x7f8   : > { %2628 = vst.msk [vmem:[%s482_s24] sm:$0x1] %vm2627_vm1, %v2626_v35 }
 0x7f9   : > { %3314 = shalt.err (!%p3311_p8)
}
 0x7fa   : > { %3115 = dma.vmem_to_hbm [thread:$0]  (%p3488_p5), %s2641_s30, 16, %s2643_s25, %s2630_s14  }
 0x7fb PF: > { %s4386_s15 = sld [smem:[#allocation12_spill]]  ;;  %p3137_p9 = scmp.ge.s32.totalorder %s3357_s28, 2 }
 0x7fd   : > { %p3128_p10 = pnand %p3137_p9, %p3492_p6 }
 0x7ff   : > { %p3129_p11 = pneg %p3128_p10 }
 0x801   : > { %s2654_s16 = sand.u32 1, %s4386_s15  }
 0x802   : > { %s2655_s21 = scalar_lea.sflag [#allocation4], %s2654_s16 }
 0x803   : > { %3340 = dma.done.wait (%p3129_p11), %s2655_s21, 16  }
 0x804   : > { %3342 = vsyncadd (%p3129_p11), %s2655_s21, 4294967280  ;;  %s4388_s28 = sld [smem:[#allocation14_spill]]  ;;  %s4391_s25 = smov %s3349_s26 }
 0x805   : > { %s4389_s22 = sld [smem:[#allocation13_spill]] }
 0x806   : > { %s4390_s27 = sld [smem:[#allocation15_spill]] }
 0x80a   : > { %p25_p12 = scmp.ge.s32.totalorder %s4388_s28, 4  }
 0x80b   : > { %s4392_s26 = smov %s4389_s22 }
 0x80c   :  { %27 = sbr.rel (!%p25_p12) target bundleno = 8 (0x8), region = 156 }
 0x811   :  { %2660 = vsyncpa [#allocation3], 1 }
 0x812   :  { %2662 = vsyncpa [#allocation3 + $0x1], 1 }
 0x813   :  { %2663 = vsyncpa [#allocation6], 1 }
 0x814   :  { %2664 = vsyncpa [#allocation4], 1 }
 0x815   :  { %2666 = vsyncpa [#allocation4 + $0x1], 1 }

</bundles_post_ra>
